<compile_context>
chip_gen: v5e
topology: v5e:2x2
jax: 0.10.0
libtpu: 0.0.40
codegen_flags: <defaults>
</compile_context>

<pallas_src>
import functools

import jax
import jax.numpy as jnp
from jax.experimental import pallas as pl
from jax.experimental.pallas import tpu as pltpu

EPS = 1e-5      # PyTorch BatchNorm2d default eps
LANE = 128      # TPU lane width: conv output channels padded to a multiple of this


def _round_up(x, m):
    return (x + m - 1) // m * m


def _tpu_budget():
    """(vmem_limit_bytes, target_rows) per TPU generation.

    128-MiB-VMEM parts (v5e/v6e): 1024-row tiles, 64 MiB scoped limit.
    64-MiB parts (v7x per TC):     512-row tiles, 40 MiB scoped limit.
    """
    vmem_cap = 128 * 1024 * 1024
    try:
        vmem_cap = int(getattr(pltpu.get_tpu_info(), "vmem_capacity_bytes", vmem_cap))
    except Exception:
        pass
    if vmem_cap >= 96 * 1024 * 1024:
        return 64 * 1024 * 1024, 1024
    return 40 * 1024 * 1024, 512


def _pick_th(Ho, Wo, target_rows):
    """Largest divisor `th` of Ho with th*Wo <= target_rows (at least 1)."""
    best = 1
    for th in range(1, Ho + 1):
        if Ho % th == 0 and th * Wo <= max(target_rows, Wo):
            best = th
    return best


# ----------------------------- weight reshaping ------------------------------------- #

def _w_taps(w, cin_pad, cout_pad):
    """(C_out, C_in, 3, 3) -> (9, cin_pad, cout_pad); tap index = dh*3 + dw."""
    c_out, c_in, kh, kw = w.shape
    wt = jnp.transpose(w, (2, 3, 1, 0)).reshape(kh * kw, c_in, c_out)
    return jnp.pad(wt, ((0, 0), (0, cin_pad - c_in), (0, cout_pad - c_out)))


def _w_mat(w, cout_pad):
    """(C_out, C_in, kh, kw) -> (kh*kw*C_in, cout_pad), matching _im2col's order."""
    c_out, c_in, kh, kw = w.shape
    wt = jnp.transpose(w, (2, 3, 1, 0)).reshape(kh * kw * c_in, c_out)
    return jnp.pad(wt, ((0, 0), (0, cout_pad - c_out)))


# ----------------------------- pass 1: conv + BN partials --------------------------- #

def _conv3x3_s1_pass1(xpad, w_taps, Ho, Wo, Cp, target_rows, vmem_limit):
    """3x3 / stride-1 / pad-1 conv with in-VMEM patch extraction.

    xpad:   (N, Ho+2, Wo+2, Cin) spatially zero-padded NHWC input (compute dtype),
            kept resident in VMEM per batch element across the row-block grid axis.
    w_taps: (9, Cin, Cp) weights (tap = dh*3 + dw), Cout zero-padded to Cp.
    Returns y (N, Ho, Wo, Cp) in xpad.dtype plus per-tile BN partial sums / sums of
    squares (N*n_hb, 1, Cp) in f32, taken from the f32 accumulator before the cast.
    """
    N, Hp, Wp, Cin = xpad.shape
    assert Hp == Ho + 2 and Wp == Wo + 2
    th = _pick_th(Ho, Wo, min(target_rows, 512))   # cap: 9-tap f32 accumulator pressure
    n_hb = Ho // th
    n_tiles = N * n_hb

    def kernel(x_ref, w_ref, y_ref, s_ref, q_ref):
        r0 = pl.multiple_of(pl.program_id(1) * th, th)
        acc = jnp.zeros((th * Wo, Cp), jnp.float32)
        for dh in range(3):
            for dw in range(3):
                tap = x_ref[0, pl.ds(r0 + dh, th), pl.ds(dw, Wo), :]
                acc = acc + jnp.dot(tap.reshape(th * Wo, Cin), w_ref[dh * 3 + dw],
                                    preferred_element_type=jnp.float32)
        y_ref[...] = acc.reshape(1, th, Wo, Cp).astype(y_ref.dtype)
        # BN statistics from the f32 accumulator (before the compute-dtype cast).
        s_ref[...] = jnp.sum(acc, axis=0).reshape(1, 1, Cp)
        q_ref[...] = jnp.sum(acc * acc, axis=0).reshape(1, 1, Cp)

    flops = 2 * N * Ho * Wo * 9 * Cin * Cp
    bytes_accessed = (xpad.size * xpad.dtype.itemsize
                      + w_taps.size * w_taps.dtype.itemsize
                      + N * Ho * Wo * Cp * xpad.dtype.itemsize
                      + 2 * n_tiles * Cp * 4)
    return pl.pallas_call(
        kernel,
        out_shape=(jax.ShapeDtypeStruct((N, Ho, Wo, Cp), xpad.dtype),
                   jax.ShapeDtypeStruct((n_tiles, 1, Cp), jnp.float32),
                   jax.ShapeDtypeStruct((n_tiles, 1, Cp), jnp.float32)),
        grid_spec=pltpu.PrefetchScalarGridSpec(
            num_scalar_prefetch=0,
            grid=(N, n_hb),
            in_specs=[
                # whole padded image: resident in VMEM across the row-block axis
                pl.BlockSpec((1, Hp, Wp, Cin), lambda n, hb: (n, 0, 0, 0)),
                # TODO(synk): pipeline_mode=pl.Buffered(1) here for the v7x VMEM budget.
                pl.BlockSpec((9, Cin, Cp), lambda n, hb: (0, 0, 0)),
            ],
            out_specs=(
                pl.BlockSpec((1, th, Wo, Cp), lambda n, hb: (n, hb, 0, 0)),
                pl.BlockSpec((1, 1, Cp), lambda n, hb: (n * n_hb + hb, 0, 0)),
                pl.BlockSpec((1, 1, Cp), lambda n, hb: (n * n_hb + hb, 0, 0)),
            )),
        compiler_params=pltpu.CompilerParams(
            dimension_semantics=("parallel", "parallel"),
            vmem_limit_bytes=vmem_limit),
        cost_estimate=pl.CostEstimate(flops=flops, transcendentals=0,
                                      bytes_accessed=bytes_accessed),
    )(xpad, w_taps)


def _im2col(x, kh, kw, stride, pad):
    """XLA-side patch extraction -> (N*Ho*Wo, kh*kw*C).  Only used for the strided
    (stride=2) conv1; stride-1 convs extract their taps in-kernel.
    TODO(synk): strided in-kernel tap extraction to drop this fallback too."""
    N, H, W, C = x.shape
    xp = jnp.pad(x, ((0, 0), (pad, pad), (pad, pad), (0, 0)))
    Ho = (H + 2 * pad - kh) // stride + 1
    Wo = (W + 2 * pad - kw) // stride + 1
    cols = []
    for i in range(kh):
        for j in range(kw):
            cols.append(xp[:, i:i + (Ho - 1) * stride + 1:stride,
                            j:j + (Wo - 1) * stride + 1:stride, :])
    patches = jnp.stack(cols, axis=3)                  # (N, Ho, Wo, kh*kw, C)
    return patches.reshape(N * Ho * Wo, kh * kw * C)


def _conv_im2col_pass1(patches, w_mat, target_rows, vmem_limit, out_dtype):
    """Row-tiled im2col matmul + per-tile BN partials (fallback for strided conv1).
    Rows are zero-padded to a tile multiple; padded rows contribute exactly zero to
    the partial sums and _bn_fold divides by the true M (padding invariant)."""
    M, K = patches.shape
    Cp = w_mat.shape[1]
    tm = min(_round_up(target_rows, 8), _round_up(M, 8))
    Mp = _round_up(M, tm)
    if Mp != M:
        patches = jnp.pad(patches, ((0, Mp - M), (0, 0)))
    n_tiles = Mp // tm

    def kernel(p_ref, w_ref, y_ref, s_ref, q_ref):
        y = jnp.dot(p_ref[...], w_ref[...], preferred_element_type=jnp.float32)
        y_ref[...] = y.astype(y_ref.dtype)
        s_ref[...] = jnp.sum(y, axis=0).reshape(1, 1, Cp)
        q_ref[...] = jnp.sum(y * y, axis=0).reshape(1, 1, Cp)

    flops = 2 * Mp * K * Cp
    bytes_accessed = (patches.size * patches.dtype.itemsize
                      + w_mat.size * w_mat.dtype.itemsize
                      + Mp * Cp * jnp.dtype(out_dtype).itemsize + 2 * n_tiles * Cp * 4)
    return pl.pallas_call(
        kernel,
        out_shape=(jax.ShapeDtypeStruct((Mp, Cp), out_dtype),
                   jax.ShapeDtypeStruct((n_tiles, 1, Cp), jnp.float32),
                   jax.ShapeDtypeStruct((n_tiles, 1, Cp), jnp.float32)),
        grid_spec=pltpu.PrefetchScalarGridSpec(
            num_scalar_prefetch=0,
            grid=(n_tiles,),
            in_specs=[pl.BlockSpec((tm, K), lambda i: (i, 0)),
                      pl.BlockSpec((K, Cp), lambda i: (0, 0))],
            out_specs=(pl.BlockSpec((tm, Cp), lambda i: (i, 0)),
                       pl.BlockSpec((1, 1, Cp), lambda i: (i, 0, 0)),
                       pl.BlockSpec((1, 1, Cp), lambda i: (i, 0, 0)))),
        compiler_params=pltpu.CompilerParams(
            dimension_semantics=("parallel",),
            vmem_limit_bytes=vmem_limit),
        cost_estimate=pl.CostEstimate(flops=flops, transcendentals=0,
                                      bytes_accessed=bytes_accessed),
    )(patches, w_mat)


def _bn_fold(s_parts, q_parts, m_rows, gamma, beta, Cp):
    """Fold training-mode BatchNorm (biased variance) + affine into per-channel
    scale/shift from per-tile f32 partial sums (reduced here in f32).
    # TODO(synk): pivoted (Welford/Chan) combination if |mean| >> sigma ever bites."""
    C = gamma.shape[0]
    s = jnp.sum(s_parts, axis=0).reshape(1, Cp)
    q = jnp.sum(q_parts, axis=0).reshape(1, Cp)
    mean = s / m_rows
    var = jnp.maximum(q / m_rows - mean * mean, 0.0)
    g = jnp.pad(gamma, (0, Cp - C), constant_values=1.0).reshape(1, Cp)
    b = jnp.pad(beta, (0, Cp - C)).reshape(1, Cp)
    scale = g * jax.lax.rsqrt(var + EPS)
    shift = b - mean * scale
    return scale.astype(jnp.float32), shift.astype(jnp.float32)


# ----------------------------- pass 2: BN + skip + ReLU ------------------------------ #

def _epilogue_identity(y, scale, shift, skip, th, vmem_limit, out_dtype):
    """BN2 (folded scale/shift) + identity residual add + ReLU over row-block tiles."""
    N, Ho, Wo, Cp = y.shape
    n_hb = Ho // th
    M = N * Ho * Wo

    def kernel(y_ref, sc_ref, sh_ref, sk_ref, o_ref):
        v = (y_ref[...].astype(jnp.float32).reshape(th * Wo, Cp) * sc_ref[...]
             + sh_ref[...]
             + sk_ref[...].astype(jnp.float32).reshape(th * Wo, Cp))
        o_ref[...] = jnp.maximum(v, 0.0).reshape(1, th, Wo, Cp).astype(o_ref.dtype)

    bytes_accessed = (y.size * y.dtype.itemsize + skip.size * skip.dtype.itemsize
                      + 2 * Cp * 4 + M * Cp * jnp.dtype(out_dtype).itemsize)
    return pl.pallas_call(
        kernel,
        out_shape=jax.ShapeDtypeStruct((N, Ho, Wo, Cp), out_dtype),
        grid_spec=pltpu.PrefetchScalarGridSpec(
            num_scalar_prefetch=0,
            grid=(N, n_hb),
            in_specs=[pl.BlockSpec((1, th, Wo, Cp), lambda n, hb: (n, hb, 0, 0)),
                      pl.BlockSpec((1, Cp), lambda n, hb: (0, 0)),
                      pl.BlockSpec((1, Cp), lambda n, hb: (0, 0)),
                      pl.BlockSpec((1, th, Wo, Cp), lambda n, hb: (n, hb, 0, 0))],
            out_specs=pl.BlockSpec((1, th, Wo, Cp), lambda n, hb: (n, hb, 0, 0))),
        compiler_params=pltpu.CompilerParams(
            dimension_semantics=("parallel", "parallel"),
            vmem_limit_bytes=vmem_limit),
        cost_estimate=pl.CostEstimate(flops=4 * M * Cp, transcendentals=0,
                                      bytes_accessed=bytes_accessed),
    )(y, scale, shift, skip)


def _epilogue_conv_skip(y, scale, shift, xs, w3, b3, th, vmem_limit, out_dtype):
    """BN2 + fused 1x1-conv skip + ReLU (no HBM round trip for the skip tensor)."""
    N, Ho, Wo, Cp = y.shape
    Cin = xs.shape[-1]
    n_hb = Ho // th
    M = N * Ho * Wo

    def kernel(y_ref, sc_ref, sh_ref, x_ref, w3_ref, b3_ref, o_ref):
        sk = jnp.dot(x_ref[0].reshape(th * Wo, Cin), w3_ref[...],
                     preferred_element_type=jnp.float32) + b3_ref[...]
        v = (y_ref[...].astype(jnp.float32).reshape(th * Wo, Cp) * sc_ref[...]
             + sh_ref[...] + sk)
        o_ref[...] = jnp.maximum(v, 0.0).reshape(1, th, Wo, Cp).astype(o_ref.dtype)

    bytes_accessed = (y.size * y.dtype.itemsize + xs.size * xs.dtype.itemsize
                      + w3.size * w3.dtype.itemsize + 3 * Cp * 4
                      + M * Cp * jnp.dtype(out_dtype).itemsize)
    return pl.pallas_call(
        kernel,
        out_shape=jax.ShapeDtypeStruct((N, Ho, Wo, Cp), out_dtype),
        grid_spec=pltpu.PrefetchScalarGridSpec(
            num_scalar_prefetch=0,
            grid=(N, n_hb),
            in_specs=[pl.BlockSpec((1, th, Wo, Cp), lambda n, hb: (n, hb, 0, 0)),
                      pl.BlockSpec((1, Cp), lambda n, hb: (0, 0)),
                      pl.BlockSpec((1, Cp), lambda n, hb: (0, 0)),
                      pl.BlockSpec((1, th, Wo, Cin), lambda n, hb: (n, hb, 0, 0)),
                      pl.BlockSpec((Cin, Cp), lambda n, hb: (0, 0)),
                      pl.BlockSpec((1, Cp), lambda n, hb: (0, 0))],
            out_specs=pl.BlockSpec((1, th, Wo, Cp), lambda n, hb: (n, hb, 0, 0))),
        compiler_params=pltpu.CompilerParams(
            dimension_semantics=("parallel", "parallel"),
            vmem_limit_bytes=vmem_limit),
        cost_estimate=pl.CostEstimate(flops=4 * M * Cp + 2 * M * Cin * Cp,
                                      transcendentals=0,
                                      bytes_accessed=bytes_accessed),
    )(y, scale, shift, xs, w3, b3)


# ----------------------------- module ------------------------------------------------ #

class ResidualPallas:
    """Mirrors torch Residual(input_channels, num_channels, use_1x1conv, strides).
    Training-mode BatchNorm (batch statistics), exact under tiling."""

    def __init__(self, input_channels, num_channels, use_1x1conv=False, strides=1,
                 key=None, compute_dtype=jnp.bfloat16, rows_per_tile=None):
        key = jax.random.PRNGKey(0) if key is None else key
        ks = jax.random.split(key, 3)

        def conv_init(k, cout, cin, kh, kw):
            fan_in = cin * kh * kw
            bound = 1.0 / float(fan_in) ** 0.5
            kw_, kb_ = jax.random.split(k)
            w = jax.random.uniform(kw_, (cout, cin, kh, kw), jnp.float32, -bound, bound)
            b = jax.random.uniform(kb_, (cout,), jnp.float32, -bound, bound)
            return w, b

        # b1/b2 kept only so the f32 reference matches PyTorch exactly; the kernels
        # drop them (a pre-BN bias is cancelled exactly by the BN mean subtraction).
        self.w1, self.b1 = conv_init(ks[0], num_channels, input_channels, 3, 3)
        self.w2, self.b2 = conv_init(ks[1], num_channels, num_channels, 3, 3)
        if use_1x1conv:
            self.w3, self.b3 = conv_init(ks[2], num_channels, input_channels, 1, 1)
        else:
            self.w3, self.b3 = None, None
        self.g1 = jnp.ones((num_channels,), jnp.float32)
        self.beta1 = jnp.zeros((num_channels,), jnp.float32)
        self.g2 = jnp.ones((num_channels,), jnp.float32)
        self.beta2 = jnp.zeros((num_channels,), jnp.float32)
        self.strides = strides
        self.num_channels = num_channels
        self.input_channels = input_channels
        self.compute_dtype = compute_dtype
        self.rows_per_tile = rows_per_tile
        self._jit_forward = jax.jit(self._forward_nchw)

    def __call__(self, x_nchw):
        return self._jit_forward(x_nchw)

    def _forward_nchw(self, x_nchw):
        # NCHW boundary kept only for parity with the PyTorch spec; forward_nhwc is
        # the transpose-free entry point for NHWC pipelines.
        x = jnp.transpose(x_nchw, (0, 2, 3, 1))
        return jnp.transpose(self.forward_nhwc(x), (0, 3, 1, 2))

    def forward_nhwc(self, x):
        N, H, W, Cin = x.shape
        s = self.strides
        C = self.num_channels
        Cp = _round_up(C, LANE)
        cd = self.compute_dtype
        Ho = (H + 2 - 3) // s + 1
        Wo = (W + 2 - 3) // s + 1
        M = N * Ho * Wo
        vmem_limit, target_rows = _tpu_budget()
        if self.rows_per_tile is not None:
            target_rows = self.rows_per_tile

        x_cd = x.astype(cd)                 # cast once, before any pad/patch expansion

        # ---- conv1 pass 1: matmul + per-tile BN partials ----
        if s == 1:
            xpad = jnp.pad(x_cd, ((0, 0), (1, 1), (1, 1), (0, 0)))
            y1, s1, q1 = _conv3x3_s1_pass1(xpad, _w_taps(self.w1, Cin, Cp).astype(cd),
                                           Ho, Wo, Cp, target_rows, vmem_limit)
        else:
            p1 = _im2col(x_cd, 3, 3, s, 1)
            y1f, s1, q1 = _conv_im2col_pass1(p1, _w_mat(self.w1, Cp).astype(cd),
                                             target_rows, vmem_limit, cd)
            y1 = y1f[:M].reshape(N, Ho, Wo, Cp)
        scale1, shift1 = _bn_fold(s1, q1, M, self.g1, self.beta1, Cp)

        # ---- BN1 + ReLU fused (by XLA) into the zero-pad that feeds conv2 ----
        # TODO(synk): move this epilogue inside conv2's pass-1 kernel (border masking)
        # to remove the remaining h1 write/read.
        h1 = jnp.maximum(y1.astype(jnp.float32) * scale1.reshape(1, 1, 1, Cp)
                         + shift1.reshape(1, 1, 1, Cp), 0.0).astype(cd)
        h1p = jnp.pad(h1, ((0, 0), (1, 1), (1, 1), (0, 0)))

        # ---- conv2 pass 1 (3x3, stride 1): in-kernel patch extraction ----
        y2, s2, q2 = _conv3x3_s1_pass1(h1p, _w_taps(self.w2, Cp, Cp).astype(cd),
                                       Ho, Wo, Cp, target_rows, vmem_limit)
        scale2, shift2 = _bn_fold(s2, q2, M, self.g2, self.beta2, Cp)

        # ---- pass 2: BN2 + residual add + ReLU (skip fused in-kernel) ----
        th = _pick_th(Ho, Wo, target_rows)
        if self.w3 is not None:
            xs = x_cd[:, ::s, ::s, :][:, :Ho, :Wo, :]            # (N, Ho, Wo, Cin)
            w3m = jnp.pad(self.w3[:, :, 0, 0].T, ((0, 0), (0, Cp - C))).astype(cd)
            b3p = jnp.pad(self.b3, (0, Cp - C)).reshape(1, Cp).astype(jnp.float32)
            out = _epilogue_conv_skip(y2, scale2, shift2, xs, w3m, b3p,
                                      th, vmem_limit, cd)
        else:
            assert s == 1 and Cin == C, (
                "identity skip requires strides == 1 and input_channels == num_channels")
            skip = x_cd if Cin == Cp else jnp.pad(
                x_cd, ((0, 0), (0, 0), (0, 0), (0, Cp - Cin)))
            out = _epilogue_identity(y2, scale2, shift2, skip, th, vmem_limit, cd)

        return out[..., :C]


# ----------------------------- pure-JAX reference ------------------------------------ #

def residual_ref(m, x):
    def conv(x, w, b, stride, pad):
        y = jax.lax.conv_general_dilated(
            x, w, (stride, stride), [(pad, pad), (pad, pad)],
            dimension_numbers=("NCHW", "OIHW", "NCHW"))
        return y + b[None, :, None, None]

    def bn(y, g, beta):
        mean = jnp.mean(y, axis=(0, 2, 3), keepdims=True)
        var = jnp.mean((y - mean) ** 2, axis=(0, 2, 3), keepdims=True)
        return (g[None, :, None, None] * (y - mean) / jnp.sqrt(var + EPS)
                + beta[None, :, None, None])

    y = jax.nn.relu(bn(conv(x, m.w1, m.b1, m.strides, 1), m.g1, m.beta1))
    y = bn(conv(y, m.w2, m.b2, 1, 1), m.g2, m.beta2)
    xs = conv(x, m.w3, m.b3, m.strides, 0) if m.w3 is not None else x
    return jax.nn.relu(y + xs)


# ----------------------------- main --------------------------------------------------- #

if __name__ == "__main__":
    x = jax.random.normal(jax.random.PRNGKey(0), (2, 4, 16, 16), jnp.float32)

    # 1) identity skip, stride 1, f32 compute, small row tiles -> multi-tile BN
    #    partials + haloed in-kernel patch extraction with nonzero row offsets.
    blk1 = ResidualPallas(4, 4, use_1x1conv=False, strides=1,
                          key=jax.random.PRNGKey(1),
                          compute_dtype=jnp.float32, rows_per_tile=64)
    out1 = blk1(x)
    jax.block_until_ready(out1)
    assert out1.shape == (2, 4, 16, 16)
    assert jnp.allclose(out1, residual_ref(blk1, x), atol=2e-4, rtol=2e-4)

    # 2) downsampling: stride-2 conv1 (XLA im2col fallback), in-kernel conv2,
    #    1x1-conv skip fused into the epilogue; f32 compute.
    blk2 = ResidualPallas(4, 8, use_1x1conv=True, strides=2,
                          key=jax.random.PRNGKey(2), compute_dtype=jnp.float32)
    out2 = blk2(x)
    jax.block_until_ready(out2)
    assert out2.shape == (2, 8, 8, 8)
    assert jnp.allclose(out2, residual_ref(blk2, x), atol=2e-4, rtol=2e-4)

    # 3) bf16 production path (MXU fast path on v6e/v7x); BN math stays f32.
    blk3 = ResidualPallas(4, 8, use_1x1conv=True, strides=2,
                          key=jax.random.PRNGKey(2), compute_dtype=jnp.bfloat16)
    out3 = blk3(x)
    jax.block_until_ready(out3)
    assert out3.shape == (2, 8, 8, 8)
    assert jnp.allclose(out3, residual_ref(blk3, x), atol=6e-2, rtol=6e-2)

    print("KERNEL_OK")
</pallas_src>

<mosaic_0001>
module attributes {stable_mosaic.version = 11 : i64} {
  func.func @kernel(%arg0: i32, %arg1: i32, %arg2: memref<1x18x18x4xf32, #tpu.memory_space<vmem>>, %arg3: memref<9x4x128xf32, #tpu.memory_space<vmem>>, %arg4: memref<1x4x16x128xf32, #tpu.memory_space<vmem>>, %arg5: memref<1x1x128xf32, #tpu.memory_space<vmem>>, %arg6: memref<1x1x128xf32, #tpu.memory_space<vmem>>) attributes {dimension_semantics = [#tpu.dimension_semantics<parallel>, #tpu.dimension_semantics<parallel>], iteration_bounds = array<i64: 2, 4>, scalar_prefetch = 0 : i64, scratch_operands = 0 : i64, tpu.core_type = #tpu.core_type<tc>, window_params = [{transform_indices = @transform_0, window_bounds = array<i64: 1, 18, 18, 4>}, {pipeline_mode = #tpu.pipeline_mode<synchronous>, transform_indices = @transform_1, window_bounds = array<i64: 9, 4, 128>}, {transform_indices = @transform_2, window_bounds = array<i64: 1, 4, 16, 128>}, {transform_indices = @transform_3, window_bounds = array<i64: 1, 1, 128>}, {transform_indices = @transform_4, window_bounds = array<i64: 1, 1, 128>}]} {
    %c4_i32 = arith.constant 4 : i32
    %0 = arith.muli %arg1, %c4_i32 : i32
    %1 = tpu.assume_multiple %0, 4 : i32
    %cst = arith.constant 0.000000e+00 : f32
    %2 = vector.broadcast %cst : f32 to vector<64x128xf32>
    %c0_i32 = arith.constant 0 : i32
    %3 = arith.addi %1, %c0_i32 : i32
    %c0 = arith.constant 0 : index
    %4 = arith.index_cast %3 : i32 to index
    %c0_0 = arith.constant 0 : index
    %c0_1 = arith.constant 0 : index
    %5 = vector.load %arg2[%c0, %4, %c0_0, %c0_1] : memref<1x18x18x4xf32, #tpu.memory_space<vmem>>, vector<1x4x16x4xf32>
    %6 = vector.shape_cast %5 : vector<1x4x16x4xf32> to vector<4x16x4xf32>
    %7 = vector.shape_cast %6 : vector<4x16x4xf32> to vector<64x4xf32>
    %c0_2 = arith.constant 0 : index
    %c0_3 = arith.constant 0 : index
    %c0_4 = arith.constant 0 : index
    %8 = vector.load %arg3[%c0_2, %c0_3, %c0_4] : memref<9x4x128xf32, #tpu.memory_space<vmem>>, vector<1x4x128xf32>
    %9 = vector.shape_cast %8 : vector<1x4x128xf32> to vector<4x128xf32>
    %cst_5 = arith.constant dense<0.000000e+00> : vector<64x128xf32>
    %10 = tpu.matmul %7, %9, %cst_5 {dimension_numbers = #tpu.dot_dimension_numbers<[1], [0], [0], [1], [0, 0, 1, 1], [], []>} : vector<64x4xf32>, vector<4x128xf32>, vector<64x128xf32> -> vector<64x128xf32>
    %11 = arith.addf %2, %10 : vector<64x128xf32>
    %c0_i32_6 = arith.constant 0 : i32
    %12 = arith.addi %1, %c0_i32_6 : i32
    %c0_7 = arith.constant 0 : index
    %13 = arith.index_cast %12 : i32 to index
    %c1 = arith.constant 1 : index
    %c0_8 = arith.constant 0 : index
    %14 = vector.load %arg2[%c0_7, %13, %c1, %c0_8] : memref<1x18x18x4xf32, #tpu.memory_space<vmem>>, vector<1x4x16x4xf32>
    %15 = vector.shape_cast %14 : vector<1x4x16x4xf32> to vector<4x16x4xf32>
    %16 = vector.shape_cast %15 : vector<4x16x4xf32> to vector<64x4xf32>
    %c1_9 = arith.constant 1 : index
    %c0_10 = arith.constant 0 : index
    %c0_11 = arith.constant 0 : index
    %17 = vector.load %arg3[%c1_9, %c0_10, %c0_11] : memref<9x4x128xf32, #tpu.memory_space<vmem>>, vector<1x4x128xf32>
    %18 = vector.shape_cast %17 : vector<1x4x128xf32> to vector<4x128xf32>
    %cst_12 = arith.constant dense<0.000000e+00> : vector<64x128xf32>
    %19 = tpu.matmul %16, %18, %cst_12 {dimension_numbers = #tpu.dot_dimension_numbers<[1], [0], [0], [1], [0, 0, 1, 1], [], []>} : vector<64x4xf32>, vector<4x128xf32>, vector<64x128xf32> -> vector<64x128xf32>
    %20 = arith.addf %11, %19 : vector<64x128xf32>
    %c0_i32_13 = arith.constant 0 : i32
    %21 = arith.addi %1, %c0_i32_13 : i32
    %c0_14 = arith.constant 0 : index
    %22 = arith.index_cast %21 : i32 to index
    %c2 = arith.constant 2 : index
    %c0_15 = arith.constant 0 : index
    %23 = vector.load %arg2[%c0_14, %22, %c2, %c0_15] : memref<1x18x18x4xf32, #tpu.memory_space<vmem>>, vector<1x4x16x4xf32>
    %24 = vector.shape_cast %23 : vector<1x4x16x4xf32> to vector<4x16x4xf32>
    %25 = vector.shape_cast %24 : vector<4x16x4xf32> to vector<64x4xf32>
    %c2_16 = arith.constant 2 : index
    %c0_17 = arith.constant 0 : index
    %c0_18 = arith.constant 0 : index
    %26 = vector.load %arg3[%c2_16, %c0_17, %c0_18] : memref<9x4x128xf32, #tpu.memory_space<vmem>>, vector<1x4x128xf32>
    %27 = vector.shape_cast %26 : vector<1x4x128xf32> to vector<4x128xf32>
    %cst_19 = arith.constant dense<0.000000e+00> : vector<64x128xf32>
    %28 = tpu.matmul %25, %27, %cst_19 {dimension_numbers = #tpu.dot_dimension_numbers<[1], [0], [0], [1], [0, 0, 1, 1], [], []>} : vector<64x4xf32>, vector<4x128xf32>, vector<64x128xf32> -> vector<64x128xf32>
    %29 = arith.addf %20, %28 : vector<64x128xf32>
    %c1_i32 = arith.constant 1 : i32
    %30 = arith.addi %1, %c1_i32 : i32
    %c0_20 = arith.constant 0 : index
    %31 = arith.index_cast %30 : i32 to index
    %c0_21 = arith.constant 0 : index
    %c0_22 = arith.constant 0 : index
    %32 = vector.load %arg2[%c0_20, %31, %c0_21, %c0_22] : memref<1x18x18x4xf32, #tpu.memory_space<vmem>>, vector<1x4x16x4xf32>
    %33 = vector.shape_cast %32 : vector<1x4x16x4xf32> to vector<4x16x4xf32>
    %34 = vector.shape_cast %33 : vector<4x16x4xf32> to vector<64x4xf32>
    %c3 = arith.constant 3 : index
    %c0_23 = arith.constant 0 : index
    %c0_24 = arith.constant 0 : index
    %35 = vector.load %arg3[%c3, %c0_23, %c0_24] : memref<9x4x128xf32, #tpu.memory_space<vmem>>, vector<1x4x128xf32>
    %36 = vector.shape_cast %35 : vector<1x4x128xf32> to vector<4x128xf32>
    %cst_25 = arith.constant dense<0.000000e+00> : vector<64x128xf32>
    %37 = tpu.matmul %34, %36, %cst_25 {dimension_numbers = #tpu.dot_dimension_numbers<[1], [0], [0], [1], [0, 0, 1, 1], [], []>} : vector<64x4xf32>, vector<4x128xf32>, vector<64x128xf32> -> vector<64x128xf32>
    %38 = arith.addf %29, %37 : vector<64x128xf32>
    %c1_i32_26 = arith.constant 1 : i32
    %39 = arith.addi %1, %c1_i32_26 : i32
    %c0_27 = arith.constant 0 : index
    %40 = arith.index_cast %39 : i32 to index
    %c1_28 = arith.constant 1 : index
    %c0_29 = arith.constant 0 : index
    %41 = vector.load %arg2[%c0_27, %40, %c1_28, %c0_29] : memref<1x18x18x4xf32, #tpu.memory_space<vmem>>, vector<1x4x16x4xf32>
    %42 = vector.shape_cast %41 : vector<1x4x16x4xf32> to vector<4x16x4xf32>
    %43 = vector.shape_cast %42 : vector<4x16x4xf32> to vector<64x4xf32>
    %c4 = arith.constant 4 : index
    %c0_30 = arith.constant 0 : index
    %c0_31 = arith.constant 0 : index
    %44 = vector.load %arg3[%c4, %c0_30, %c0_31] : memref<9x4x128xf32, #tpu.memory_space<vmem>>, vector<1x4x128xf32>
    %45 = vector.shape_cast %44 : vector<1x4x128xf32> to vector<4x128xf32>
    %cst_32 = arith.constant dense<0.000000e+00> : vector<64x128xf32>
    %46 = tpu.matmul %43, %45, %cst_32 {dimension_numbers = #tpu.dot_dimension_numbers<[1], [0], [0], [1], [0, 0, 1, 1], [], []>} : vector<64x4xf32>, vector<4x128xf32>, vector<64x128xf32> -> vector<64x128xf32>
    %47 = arith.addf %38, %46 : vector<64x128xf32>
    %c1_i32_33 = arith.constant 1 : i32
    %48 = arith.addi %1, %c1_i32_33 : i32
    %c0_34 = arith.constant 0 : index
    %49 = arith.index_cast %48 : i32 to index
    %c2_35 = arith.constant 2 : index
    %c0_36 = arith.constant 0 : index
    %50 = vector.load %arg2[%c0_34, %49, %c2_35, %c0_36] : memref<1x18x18x4xf32, #tpu.memory_space<vmem>>, vector<1x4x16x4xf32>
    %51 = vector.shape_cast %50 : vector<1x4x16x4xf32> to vector<4x16x4xf32>
    %52 = vector.shape_cast %51 : vector<4x16x4xf32> to vector<64x4xf32>
    %c5 = arith.constant 5 : index
    %c0_37 = arith.constant 0 : index
    %c0_38 = arith.constant 0 : index
    %53 = vector.load %arg3[%c5, %c0_37, %c0_38] : memref<9x4x128xf32, #tpu.memory_space<vmem>>, vector<1x4x128xf32>
    %54 = vector.shape_cast %53 : vector<1x4x128xf32> to vector<4x128xf32>
    %cst_39 = arith.constant dense<0.000000e+00> : vector<64x128xf32>
    %55 = tpu.matmul %52, %54, %cst_39 {dimension_numbers = #tpu.dot_dimension_numbers<[1], [0], [0], [1], [0, 0, 1, 1], [], []>} : vector<64x4xf32>, vector<4x128xf32>, vector<64x128xf32> -> vector<64x128xf32>
    %56 = arith.addf %47, %55 : vector<64x128xf32>
    %c2_i32 = arith.constant 2 : i32
    %57 = arith.addi %1, %c2_i32 : i32
    %c0_40 = arith.constant 0 : index
    %58 = arith.index_cast %57 : i32 to index
    %c0_41 = arith.constant 0 : index
    %c0_42 = arith.constant 0 : index
    %59 = vector.load %arg2[%c0_40, %58, %c0_41, %c0_42] : memref<1x18x18x4xf32, #tpu.memory_space<vmem>>, vector<1x4x16x4xf32>
    %60 = vector.shape_cast %59 : vector<1x4x16x4xf32> to vector<4x16x4xf32>
    %61 = vector.shape_cast %60 : vector<4x16x4xf32> to vector<64x4xf32>
    %c6 = arith.constant 6 : index
    %c0_43 = arith.constant 0 : index
    %c0_44 = arith.constant 0 : index
    %62 = vector.load %arg3[%c6, %c0_43, %c0_44] : memref<9x4x128xf32, #tpu.memory_space<vmem>>, vector<1x4x128xf32>
    %63 = vector.shape_cast %62 : vector<1x4x128xf32> to vector<4x128xf32>
    %cst_45 = arith.constant dense<0.000000e+00> : vector<64x128xf32>
    %64 = tpu.matmul %61, %63, %cst_45 {dimension_numbers = #tpu.dot_dimension_numbers<[1], [0], [0], [1], [0, 0, 1, 1], [], []>} : vector<64x4xf32>, vector<4x128xf32>, vector<64x128xf32> -> vector<64x128xf32>
    %65 = arith.addf %56, %64 : vector<64x128xf32>
    %c2_i32_46 = arith.constant 2 : i32
    %66 = arith.addi %1, %c2_i32_46 : i32
    %c0_47 = arith.constant 0 : index
    %67 = arith.index_cast %66 : i32 to index
    %c1_48 = arith.constant 1 : index
    %c0_49 = arith.constant 0 : index
    %68 = vector.load %arg2[%c0_47, %67, %c1_48, %c0_49] : memref<1x18x18x4xf32, #tpu.memory_space<vmem>>, vector<1x4x16x4xf32>
    %69 = vector.shape_cast %68 : vector<1x4x16x4xf32> to vector<4x16x4xf32>
    %70 = vector.shape_cast %69 : vector<4x16x4xf32> to vector<64x4xf32>
    %c7 = arith.constant 7 : index
    %c0_50 = arith.constant 0 : index
    %c0_51 = arith.constant 0 : index
    %71 = vector.load %arg3[%c7, %c0_50, %c0_51] : memref<9x4x128xf32, #tpu.memory_space<vmem>>, vector<1x4x128xf32>
    %72 = vector.shape_cast %71 : vector<1x4x128xf32> to vector<4x128xf32>
    %cst_52 = arith.constant dense<0.000000e+00> : vector<64x128xf32>
    %73 = tpu.matmul %70, %72, %cst_52 {dimension_numbers = #tpu.dot_dimension_numbers<[1], [0], [0], [1], [0, 0, 1, 1], [], []>} : vector<64x4xf32>, vector<4x128xf32>, vector<64x128xf32> -> vector<64x128xf32>
    %74 = arith.addf %65, %73 : vector<64x128xf32>
    %c2_i32_53 = arith.constant 2 : i32
    %75 = arith.addi %1, %c2_i32_53 : i32
    %c0_54 = arith.constant 0 : index
    %76 = arith.index_cast %75 : i32 to index
    %c2_55 = arith.constant 2 : index
    %c0_56 = arith.constant 0 : index
    %77 = vector.load %arg2[%c0_54, %76, %c2_55, %c0_56] : memref<1x18x18x4xf32, #tpu.memory_space<vmem>>, vector<1x4x16x4xf32>
    %78 = vector.shape_cast %77 : vector<1x4x16x4xf32> to vector<4x16x4xf32>
    %79 = vector.shape_cast %78 : vector<4x16x4xf32> to vector<64x4xf32>
    %c8 = arith.constant 8 : index
    %c0_57 = arith.constant 0 : index
    %c0_58 = arith.constant 0 : index
    %80 = vector.load %arg3[%c8, %c0_57, %c0_58] : memref<9x4x128xf32, #tpu.memory_space<vmem>>, vector<1x4x128xf32>
    %81 = vector.shape_cast %80 : vector<1x4x128xf32> to vector<4x128xf32>
    %cst_59 = arith.constant dense<0.000000e+00> : vector<64x128xf32>
    %82 = tpu.matmul %79, %81, %cst_59 {dimension_numbers = #tpu.dot_dimension_numbers<[1], [0], [0], [1], [0, 0, 1, 1], [], []>} : vector<64x4xf32>, vector<4x128xf32>, vector<64x128xf32> -> vector<64x128xf32>
    %83 = arith.addf %74, %82 : vector<64x128xf32>
    %84 = vector.shape_cast %83 : vector<64x128xf32> to vector<1x4x16x128xf32>
    %c0_60 = arith.constant 0 : index
    %c0_61 = arith.constant 0 : index
    %c0_62 = arith.constant 0 : index
    %c0_63 = arith.constant 0 : index
    %85 = vector.load %arg4[%c0_60, %c0_61, %c0_62, %c0_63] : memref<1x4x16x128xf32, #tpu.memory_space<vmem>>, vector<1x4x16x128xf32>
    tpu.vector_store %arg4[%c0_60, %c0_61, %c0_62, %c0_63], %84 {strides = array<i32>} : memref<1x4x16x128xf32, #tpu.memory_space<vmem>>, vector<1x4x16x128xf32>,
    %cst_64 = arith.constant dense<0.000000e+00> : vector<128xf32>
    %86 = vector.multi_reduction <add>, %83, %cst_64 [0] : vector<64x128xf32> to vector<128xf32>
    %87 = vector.shape_cast %86 : vector<128xf32> to vector<1x1x128xf32>
    %c0_65 = arith.constant 0 : index
    %c0_66 = arith.constant 0 : index
    %c0_67 = arith.constant 0 : index
    %88 = vector.load %arg5[%c0_65, %c0_66, %c0_67] : memref<1x1x128xf32, #tpu.memory_space<vmem>>, vector<1x1x128xf32>
    tpu.vector_store %arg5[%c0_65, %c0_66, %c0_67], %87 {strides = array<i32>} : memref<1x1x128xf32, #tpu.memory_space<vmem>>, vector<1x1x128xf32>,
    %89 = arith.mulf %83, %83 : vector<64x128xf32>
    %cst_68 = arith.constant dense<0.000000e+00> : vector<128xf32>
    %90 = vector.multi_reduction <add>, %89, %cst_68 [0] : vector<64x128xf32> to vector<128xf32>
    %91 = vector.shape_cast %90 : vector<128xf32> to vector<1x1x128xf32>
    %c0_69 = arith.constant 0 : index
    %c0_70 = arith.constant 0 : index
    %c0_71 = arith.constant 0 : index
    %92 = vector.load %arg6[%c0_69, %c0_70, %c0_71] : memref<1x1x128xf32, #tpu.memory_space<vmem>>, vector<1x1x128xf32>
    tpu.vector_store %arg6[%c0_69, %c0_70, %c0_71], %91 {strides = array<i32>} : memref<1x1x128xf32, #tpu.memory_space<vmem>>, vector<1x1x128xf32>,
    return
  }
  func.func @transform_0(%arg0: i32, %arg1: i32) -> (i32, i32, i32, i32) {
    %c0_i32 = arith.constant 0 : i32
    %c0_i32_0 = arith.constant 0 : i32
    %c0_i32_1 = arith.constant 0 : i32
    %c0_i32_2 = arith.constant 0 : i32
    return %arg0, %c0_i32, %c0_i32_0, %c0_i32_1 : i32, i32, i32, i32
  }
  func.func @transform_1(%arg0: i32, %arg1: i32) -> (i32, i32, i32) {
    %c0_i32 = arith.constant 0 : i32
    %c0_i32_0 = arith.constant 0 : i32
    %c0_i32_1 = arith.constant 0 : i32
    %c0_i32_2 = arith.constant 0 : i32
    return %c0_i32, %c0_i32_0, %c0_i32_1 : i32, i32, i32
  }
  func.func @transform_2(%arg0: i32, %arg1: i32) -> (i32, i32, i32, i32) {
    %c0_i32 = arith.constant 0 : i32
    %c0_i32_0 = arith.constant 0 : i32
    %c0_i32_1 = arith.constant 0 : i32
    return %arg0, %arg1, %c0_i32, %c0_i32_0 : i32, i32, i32, i32
  }
  func.func @transform_3(%arg0: i32, %arg1: i32) -> (i32, i32, i32) {
    %c4_i32 = arith.constant 4 : i32
    %0 = arith.muli %arg0, %c4_i32 : i32
    %1 = arith.addi %0, %arg1 : i32
    %c0_i32 = arith.constant 0 : i32
    %c0_i32_0 = arith.constant 0 : i32
    %c0_i32_1 = arith.constant 0 : i32
    return %1, %c0_i32, %c0_i32_0 : i32, i32, i32
  }
  func.func @transform_4(%arg0: i32, %arg1: i32) -> (i32, i32, i32) {
    %c4_i32 = arith.constant 4 : i32
    %0 = arith.muli %arg0, %c4_i32 : i32
    %1 = arith.addi %0, %arg1 : i32
    %c0_i32 = arith.constant 0 : i32
    %c0_i32_0 = arith.constant 0 : i32
    %c0_i32_1 = arith.constant 0 : i32
    return %1, %c0_i32, %c0_i32_0 : i32, i32, i32
  }
}

module attributes {stable_mosaic.version = 11 : i64} {
  func.func @kernel(%arg0: i32, %arg1: i32, %arg2: memref<1x18x18x128xf32, #tpu.memory_space<vmem>>, %arg3: memref<9x128x128xf32, #tpu.memory_space<vmem>>, %arg4: memref<1x4x16x128xf32, #tpu.memory_space<vmem>>, %arg5: memref<1x1x128xf32, #tpu.memory_space<vmem>>, %arg6: memref<1x1x128xf32, #tpu.memory_space<vmem>>) attributes {dimension_semantics = [#tpu.dimension_semantics<parallel>, #tpu.dimension_semantics<parallel>], iteration_bounds = array<i64: 2, 4>, scalar_prefetch = 0 : i64, scratch_operands = 0 : i64, tpu.core_type = #tpu.core_type<tc>, window_params = [{transform_indices = @transform_0, window_bounds = array<i64: 1, 18, 18, 128>}, {pipeline_mode = #tpu.pipeline_mode<synchronous>, transform_indices = @transform_1, window_bounds = array<i64: 9, 128, 128>}, {transform_indices = @transform_2, window_bounds = array<i64: 1, 4, 16, 128>}, {transform_indices = @transform_3, window_bounds = array<i64: 1, 1, 128>}, {transform_indices = @transform_4, window_bounds = array<i64: 1, 1, 128>}]} {
    %c4_i32 = arith.constant 4 : i32
    %0 = arith.muli %arg1, %c4_i32 : i32
    %1 = tpu.assume_multiple %0, 4 : i32
    %cst = arith.constant 0.000000e+00 : f32
    %2 = vector.broadcast %cst : f32 to vector<64x128xf32>
    %c0_i32 = arith.constant 0 : i32
    %3 = arith.addi %1, %c0_i32 : i32
    %c0 = arith.constant 0 : index
    %4 = arith.index_cast %3 : i32 to index
    %c0_0 = arith.constant 0 : index
    %c0_1 = arith.constant 0 : index
    %5 = vector.load %arg2[%c0, %4, %c0_0, %c0_1] : memref<1x18x18x128xf32, #tpu.memory_space<vmem>>, vector<1x4x16x128xf32>
    %6 = vector.shape_cast %5 : vector<1x4x16x128xf32> to vector<4x16x128xf32>
    %7 = vector.shape_cast %6 : vector<4x16x128xf32> to vector<64x128xf32>
    %c0_2 = arith.constant 0 : index
    %c0_3 = arith.constant 0 : index
    %c0_4 = arith.constant 0 : index
    %8 = vector.load %arg3[%c0_2, %c0_3, %c0_4] : memref<9x128x128xf32, #tpu.memory_space<vmem>>, vector<1x128x128xf32>
    %9 = vector.shape_cast %8 : vector<1x128x128xf32> to vector<128x128xf32>
    %cst_5 = arith.constant dense<0.000000e+00> : vector<64x128xf32>
    %10 = tpu.matmul %7, %9, %cst_5 {dimension_numbers = #tpu.dot_dimension_numbers<[1], [0], [0], [1], [0, 0, 1, 1], [], []>} : vector<64x128xf32>, vector<128x128xf32>, vector<64x128xf32> -> vector<64x128xf32>
    %11 = arith.addf %2, %10 : vector<64x128xf32>
    %c0_i32_6 = arith.constant 0 : i32
    %12 = arith.addi %1, %c0_i32_6 : i32
    %c0_7 = arith.constant 0 : index
    %13 = arith.index_cast %12 : i32 to index
    %c1 = arith.constant 1 : index
    %c0_8 = arith.constant 0 : index
    %14 = vector.load %arg2[%c0_7, %13, %c1, %c0_8] : memref<1x18x18x128xf32, #tpu.memory_space<vmem>>, vector<1x4x16x128xf32>
    %15 = vector.shape_cast %14 : vector<1x4x16x128xf32> to vector<4x16x128xf32>
    %16 = vector.shape_cast %15 : vector<4x16x128xf32> to vector<64x128xf32>
    %c1_9 = arith.constant 1 : index
    %c0_10 = arith.constant 0 : index
    %c0_11 = arith.constant 0 : index
    %17 = vector.load %arg3[%c1_9, %c0_10, %c0_11] : memref<9x128x128xf32, #tpu.memory_space<vmem>>, vector<1x128x128xf32>
    %18 = vector.shape_cast %17 : vector<1x128x128xf32> to vector<128x128xf32>
    %cst_12 = arith.constant dense<0.000000e+00> : vector<64x128xf32>
    %19 = tpu.matmul %16, %18, %cst_12 {dimension_numbers = #tpu.dot_dimension_numbers<[1], [0], [0], [1], [0, 0, 1, 1], [], []>} : vector<64x128xf32>, vector<128x128xf32>, vector<64x128xf32> -> vector<64x128xf32>
    %20 = arith.addf %11, %19 : vector<64x128xf32>
    %c0_i32_13 = arith.constant 0 : i32
    %21 = arith.addi %1, %c0_i32_13 : i32
    %c0_14 = arith.constant 0 : index
    %22 = arith.index_cast %21 : i32 to index
    %c2 = arith.constant 2 : index
    %c0_15 = arith.constant 0 : index
    %23 = vector.load %arg2[%c0_14, %22, %c2, %c0_15] : memref<1x18x18x128xf32, #tpu.memory_space<vmem>>, vector<1x4x16x128xf32>
    %24 = vector.shape_cast %23 : vector<1x4x16x128xf32> to vector<4x16x128xf32>
    %25 = vector.shape_cast %24 : vector<4x16x128xf32> to vector<64x128xf32>
    %c2_16 = arith.constant 2 : index
    %c0_17 = arith.constant 0 : index
    %c0_18 = arith.constant 0 : index
    %26 = vector.load %arg3[%c2_16, %c0_17, %c0_18] : memref<9x128x128xf32, #tpu.memory_space<vmem>>, vector<1x128x128xf32>
    %27 = vector.shape_cast %26 : vector<1x128x128xf32> to vector<128x128xf32>
    %cst_19 = arith.constant dense<0.000000e+00> : vector<64x128xf32>
    %28 = tpu.matmul %25, %27, %cst_19 {dimension_numbers = #tpu.dot_dimension_numbers<[1], [0], [0], [1], [0, 0, 1, 1], [], []>} : vector<64x128xf32>, vector<128x128xf32>, vector<64x128xf32> -> vector<64x128xf32>
    %29 = arith.addf %20, %28 : vector<64x128xf32>
    %c1_i32 = arith.constant 1 : i32
    %30 = arith.addi %1, %c1_i32 : i32
    %c0_20 = arith.constant 0 : index
    %31 = arith.index_cast %30 : i32 to index
    %c0_21 = arith.constant 0 : index
    %c0_22 = arith.constant 0 : index
    %32 = vector.load %arg2[%c0_20, %31, %c0_21, %c0_22] : memref<1x18x18x128xf32, #tpu.memory_space<vmem>>, vector<1x4x16x128xf32>
    %33 = vector.shape_cast %32 : vector<1x4x16x128xf32> to vector<4x16x128xf32>
    %34 = vector.shape_cast %33 : vector<4x16x128xf32> to vector<64x128xf32>
    %c3 = arith.constant 3 : index
    %c0_23 = arith.constant 0 : index
    %c0_24 = arith.constant 0 : index
    %35 = vector.load %arg3[%c3, %c0_23, %c0_24] : memref<9x128x128xf32, #tpu.memory_space<vmem>>, vector<1x128x128xf32>
    %36 = vector.shape_cast %35 : vector<1x128x128xf32> to vector<128x128xf32>
    %cst_25 = arith.constant dense<0.000000e+00> : vector<64x128xf32>
    %37 = tpu.matmul %34, %36, %cst_25 {dimension_numbers = #tpu.dot_dimension_numbers<[1], [0], [0], [1], [0, 0, 1, 1], [], []>} : vector<64x128xf32>, vector<128x128xf32>, vector<64x128xf32> -> vector<64x128xf32>
    %38 = arith.addf %29, %37 : vector<64x128xf32>
    %c1_i32_26 = arith.constant 1 : i32
    %39 = arith.addi %1, %c1_i32_26 : i32
    %c0_27 = arith.constant 0 : index
    %40 = arith.index_cast %39 : i32 to index
    %c1_28 = arith.constant 1 : index
    %c0_29 = arith.constant 0 : index
    %41 = vector.load %arg2[%c0_27, %40, %c1_28, %c0_29] : memref<1x18x18x128xf32, #tpu.memory_space<vmem>>, vector<1x4x16x128xf32>
    %42 = vector.shape_cast %41 : vector<1x4x16x128xf32> to vector<4x16x128xf32>
    %43 = vector.shape_cast %42 : vector<4x16x128xf32> to vector<64x128xf32>
    %c4 = arith.constant 4 : index
    %c0_30 = arith.constant 0 : index
    %c0_31 = arith.constant 0 : index
    %44 = vector.load %arg3[%c4, %c0_30, %c0_31] : memref<9x128x128xf32, #tpu.memory_space<vmem>>, vector<1x128x128xf32>
    %45 = vector.shape_cast %44 : vector<1x128x128xf32> to vector<128x128xf32>
    %cst_32 = arith.constant dense<0.000000e+00> : vector<64x128xf32>
    %46 = tpu.matmul %43, %45, %cst_32 {dimension_numbers = #tpu.dot_dimension_numbers<[1], [0], [0], [1], [0, 0, 1, 1], [], []>} : vector<64x128xf32>, vector<128x128xf32>, vector<64x128xf32> -> vector<64x128xf32>
    %47 = arith.addf %38, %46 : vector<64x128xf32>
    %c1_i32_33 = arith.constant 1 : i32
    %48 = arith.addi %1, %c1_i32_33 : i32
    %c0_34 = arith.constant 0 : index
    %49 = arith.index_cast %48 : i32 to index
    %c2_35 = arith.constant 2 : index
    %c0_36 = arith.constant 0 : index
    %50 = vector.load %arg2[%c0_34, %49, %c2_35, %c0_36] : memref<1x18x18x128xf32, #tpu.memory_space<vmem>>, vector<1x4x16x128xf32>
    %51 = vector.shape_cast %50 : vector<1x4x16x128xf32> to vector<4x16x128xf32>
    %52 = vector.shape_cast %51 : vector<4x16x128xf32> to vector<64x128xf32>
    %c5 = arith.constant 5 : index
    %c0_37 = arith.constant 0 : index
    %c0_38 = arith.constant 0 : index
    %53 = vector.load %arg3[%c5, %c0_37, %c0_38] : memref<9x128x128xf32, #tpu.memory_space<vmem>>, vector<1x128x128xf32>
    %54 = vector.shape_cast %53 : vector<1x128x128xf32> to vector<128x128xf32>
    %cst_39 = arith.constant dense<0.000000e+00> : vector<64x128xf32>
    %55 = tpu.matmul %52, %54, %cst_39 {dimension_numbers = #tpu.dot_dimension_numbers<[1], [0], [0], [1], [0, 0, 1, 1], [], []>} : vector<64x128xf32>, vector<128x128xf32>, vector<64x128xf32> -> vector<64x128xf32>
    %56 = arith.addf %47, %55 : vector<64x128xf32>
    %c2_i32 = arith.constant 2 : i32
    %57 = arith.addi %1, %c2_i32 : i32
    %c0_40 = arith.constant 0 : index
    %58 = arith.index_cast %57 : i32 to index
    %c0_41 = arith.constant 0 : index
    %c0_42 = arith.constant 0 : index
    %59 = vector.load %arg2[%c0_40, %58, %c0_41, %c0_42] : memref<1x18x18x128xf32, #tpu.memory_space<vmem>>, vector<1x4x16x128xf32>
    %60 = vector.shape_cast %59 : vector<1x4x16x128xf32> to vector<4x16x128xf32>
    %61 = vector.shape_cast %60 : vector<4x16x128xf32> to vector<64x128xf32>
    %c6 = arith.constant 6 : index
    %c0_43 = arith.constant 0 : index
    %c0_44 = arith.constant 0 : index
    %62 = vector.load %arg3[%c6, %c0_43, %c0_44] : memref<9x128x128xf32, #tpu.memory_space<vmem>>, vector<1x128x128xf32>
    %63 = vector.shape_cast %62 : vector<1x128x128xf32> to vector<128x128xf32>
    %cst_45 = arith.constant dense<0.000000e+00> : vector<64x128xf32>
    %64 = tpu.matmul %61, %63, %cst_45 {dimension_numbers = #tpu.dot_dimension_numbers<[1], [0], [0], [1], [0, 0, 1, 1], [], []>} : vector<64x128xf32>, vector<128x128xf32>, vector<64x128xf32> -> vector<64x128xf32>
    %65 = arith.addf %56, %64 : vector<64x128xf32>
    %c2_i32_46 = arith.constant 2 : i32
    %66 = arith.addi %1, %c2_i32_46 : i32
    %c0_47 = arith.constant 0 : index
    %67 = arith.index_cast %66 : i32 to index
    %c1_48 = arith.constant 1 : index
    %c0_49 = arith.constant 0 : index
    %68 = vector.load %arg2[%c0_47, %67, %c1_48, %c0_49] : memref<1x18x18x128xf32, #tpu.memory_space<vmem>>, vector<1x4x16x128xf32>
    %69 = vector.shape_cast %68 : vector<1x4x16x128xf32> to vector<4x16x128xf32>
    %70 = vector.shape_cast %69 : vector<4x16x128xf32> to vector<64x128xf32>
    %c7 = arith.constant 7 : index
    %c0_50 = arith.constant 0 : index
    %c0_51 = arith.constant 0 : index
    %71 = vector.load %arg3[%c7, %c0_50, %c0_51] : memref<9x128x128xf32, #tpu.memory_space<vmem>>, vector<1x128x128xf32>
    %72 = vector.shape_cast %71 : vector<1x128x128xf32> to vector<128x128xf32>
    %cst_52 = arith.constant dense<0.000000e+00> : vector<64x128xf32>
    %73 = tpu.matmul %70, %72, %cst_52 {dimension_numbers = #tpu.dot_dimension_numbers<[1], [0], [0], [1], [0, 0, 1, 1], [], []>} : vector<64x128xf32>, vector<128x128xf32>, vector<64x128xf32> -> vector<64x128xf32>
    %74 = arith.addf %65, %73 : vector<64x128xf32>
    %c2_i32_53 = arith.constant 2 : i32
    %75 = arith.addi %1, %c2_i32_53 : i32
    %c0_54 = arith.constant 0 : index
    %76 = arith.index_cast %75 : i32 to index
    %c2_55 = arith.constant 2 : index
    %c0_56 = arith.constant 0 : index
    %77 = vector.load %arg2[%c0_54, %76, %c2_55, %c0_56] : memref<1x18x18x128xf32, #tpu.memory_space<vmem>>, vector<1x4x16x128xf32>
    %78 = vector.shape_cast %77 : vector<1x4x16x128xf32> to vector<4x16x128xf32>
    %79 = vector.shape_cast %78 : vector<4x16x128xf32> to vector<64x128xf32>
    %c8 = arith.constant 8 : index
    %c0_57 = arith.constant 0 : index
    %c0_58 = arith.constant 0 : index
    %80 = vector.load %arg3[%c8, %c0_57, %c0_58] : memref<9x128x128xf32, #tpu.memory_space<vmem>>, vector<1x128x128xf32>
    %81 = vector.shape_cast %80 : vector<1x128x128xf32> to vector<128x128xf32>
    %cst_59 = arith.constant dense<0.000000e+00> : vector<64x128xf32>
    %82 = tpu.matmul %79, %81, %cst_59 {dimension_numbers = #tpu.dot_dimension_numbers<[1], [0], [0], [1], [0, 0, 1, 1], [], []>} : vector<64x128xf32>, vector<128x128xf32>, vector<64x128xf32> -> vector<64x128xf32>
    %83 = arith.addf %74, %82 : vector<64x128xf32>
    %84 = vector.shape_cast %83 : vector<64x128xf32> to vector<1x4x16x128xf32>
    %c0_60 = arith.constant 0 : index
    %c0_61 = arith.constant 0 : index
    %c0_62 = arith.constant 0 : index
    %c0_63 = arith.constant 0 : index
    %85 = vector.load %arg4[%c0_60, %c0_61, %c0_62, %c0_63] : memref<1x4x16x128xf32, #tpu.memory_space<vmem>>, vector<1x4x16x128xf32>
    tpu.vector_store %arg4[%c0_60, %c0_61, %c0_62, %c0_63], %84 {strides = array<i32>} : memref<1x4x16x128xf32, #tpu.memory_space<vmem>>, vector<1x4x16x128xf32>,
    %cst_64 = arith.constant dense<0.000000e+00> : vector<128xf32>
    %86 = vector.multi_reduction <add>, %83, %cst_64 [0] : vector<64x128xf32> to vector<128xf32>
    %87 = vector.shape_cast %86 : vector<128xf32> to vector<1x1x128xf32>
    %c0_65 = arith.constant 0 : index
    %c0_66 = arith.constant 0 : index
    %c0_67 = arith.constant 0 : index
    %88 = vector.load %arg5[%c0_65, %c0_66, %c0_67] : memref<1x1x128xf32, #tpu.memory_space<vmem>>, vector<1x1x128xf32>
    tpu.vector_store %arg5[%c0_65, %c0_66, %c0_67], %87 {strides = array<i32>} : memref<1x1x128xf32, #tpu.memory_space<vmem>>, vector<1x1x128xf32>,
    %89 = arith.mulf %83, %83 : vector<64x128xf32>
    %cst_68 = arith.constant dense<0.000000e+00> : vector<128xf32>
    %90 = vector.multi_reduction <add>, %89, %cst_68 [0] : vector<64x128xf32> to vector<128xf32>
    %91 = vector.shape_cast %90 : vector<128xf32> to vector<1x1x128xf32>
    %c0_69 = arith.constant 0 : index
    %c0_70 = arith.constant 0 : index
    %c0_71 = arith.constant 0 : index
    %92 = vector.load %arg6[%c0_69, %c0_70, %c0_71] : memref<1x1x128xf32, #tpu.memory_space<vmem>>, vector<1x1x128xf32>
    tpu.vector_store %arg6[%c0_69, %c0_70, %c0_71], %91 {strides = array<i32>} : memref<1x1x128xf32, #tpu.memory_space<vmem>>, vector<1x1x128xf32>,
    return
  }
  func.func @transform_0(%arg0: i32, %arg1: i32) -> (i32, i32, i32, i32) {
    %c0_i32 = arith.constant 0 : i32
    %c0_i32_0 = arith.constant 0 : i32
    %c0_i32_1 = arith.constant 0 : i32
    %c0_i32_2 = arith.constant 0 : i32
    return %arg0, %c0_i32, %c0_i32_0, %c0_i32_1 : i32, i32, i32, i32
  }
  func.func @transform_1(%arg0: i32, %arg1: i32) -> (i32, i32, i32) {
    %c0_i32 = arith.constant 0 : i32
    %c0_i32_0 = arith.constant 0 : i32
    %c0_i32_1 = arith.constant 0 : i32
    %c0_i32_2 = arith.constant 0 : i32
    return %c0_i32, %c0_i32_0, %c0_i32_1 : i32, i32, i32
  }
  func.func @transform_2(%arg0: i32, %arg1: i32) -> (i32, i32, i32, i32) {
    %c0_i32 = arith.constant 0 : i32
    %c0_i32_0 = arith.constant 0 : i32
    %c0_i32_1 = arith.constant 0 : i32
    return %arg0, %arg1, %c0_i32, %c0_i32_0 : i32, i32, i32, i32
  }
  func.func @transform_3(%arg0: i32, %arg1: i32) -> (i32, i32, i32) {
    %c4_i32 = arith.constant 4 : i32
    %0 = arith.muli %arg0, %c4_i32 : i32
    %1 = arith.addi %0, %arg1 : i32
    %c0_i32 = arith.constant 0 : i32
    %c0_i32_0 = arith.constant 0 : i32
    %c0_i32_1 = arith.constant 0 : i32
    return %1, %c0_i32, %c0_i32_0 : i32, i32, i32
  }
  func.func @transform_4(%arg0: i32, %arg1: i32) -> (i32, i32, i32) {
    %c4_i32 = arith.constant 4 : i32
    %0 = arith.muli %arg0, %c4_i32 : i32
    %1 = arith.addi %0, %arg1 : i32
    %c0_i32 = arith.constant 0 : i32
    %c0_i32_0 = arith.constant 0 : i32
    %c0_i32_1 = arith.constant 0 : i32
    return %1, %c0_i32, %c0_i32_0 : i32, i32, i32
  }
}

module attributes {stable_mosaic.version = 11 : i64} {
  func.func @kernel(%arg0: i32, %arg1: i32, %arg2: memref<1x4x16x128xf32, #tpu.memory_space<vmem>>, %arg3: memref<1x128xf32, #tpu.memory_space<vmem>>, %arg4: memref<1x128xf32, #tpu.memory_space<vmem>>, %arg5: memref<1x4x16x128xf32, #tpu.memory_space<vmem>>, %arg6: memref<1x4x16x128xf32, #tpu.memory_space<vmem>>) attributes {dimension_semantics = [#tpu.dimension_semantics<parallel>, #tpu.dimension_semantics<parallel>], iteration_bounds = array<i64: 2, 4>, scalar_prefetch = 0 : i64, scratch_operands = 0 : i64, tpu.core_type = #tpu.core_type<tc>, window_params = [{transform_indices = @transform_0, window_bounds = array<i64: 1, 4, 16, 128>}, {pipeline_mode = #tpu.pipeline_mode<synchronous>, transform_indices = @transform_1, window_bounds = array<i64: 1, 128>}, {pipeline_mode = #tpu.pipeline_mode<synchronous>, transform_indices = @transform_2, window_bounds = array<i64: 1, 128>}, {transform_indices = @transform_3, window_bounds = array<i64: 1, 4, 16, 128>}, {transform_indices = @transform_4, window_bounds = array<i64: 1, 4, 16, 128>}]} {
    %c0 = arith.constant 0 : index
    %c0_0 = arith.constant 0 : index
    %c0_1 = arith.constant 0 : index
    %c0_2 = arith.constant 0 : index
    %0 = vector.load %arg2[%c0, %c0_0, %c0_1, %c0_2] : memref<1x4x16x128xf32, #tpu.memory_space<vmem>>, vector<1x4x16x128xf32>
    %1 = vector.shape_cast %0 : vector<1x4x16x128xf32> to vector<64x128xf32>
    %c0_3 = arith.constant 0 : index
    %c0_4 = arith.constant 0 : index
    %2 = vector.load %arg3[%c0_3, %c0_4] : memref<1x128xf32, #tpu.memory_space<vmem>>, vector<1x128xf32>
    %3 = vector.broadcast %2 : vector<1x128xf32> to vector<64x128xf32>
    %4 = arith.mulf %1, %3 : vector<64x128xf32>
    %c0_5 = arith.constant 0 : index
    %c0_6 = arith.constant 0 : index
    %5 = vector.load %arg4[%c0_5, %c0_6] : memref<1x128xf32, #tpu.memory_space<vmem>>, vector<1x128xf32>
    %6 = vector.broadcast %5 : vector<1x128xf32> to vector<64x128xf32>
    %7 = arith.addf %4, %6 : vector<64x128xf32>
    %c0_7 = arith.constant 0 : index
    %c0_8 = arith.constant 0 : index
    %c0_9 = arith.constant 0 : index
    %c0_10 = arith.constant 0 : index
    %8 = vector.load %arg5[%c0_7, %c0_8, %c0_9, %c0_10] : memref<1x4x16x128xf32, #tpu.memory_space<vmem>>, vector<1x4x16x128xf32>
    %9 = vector.shape_cast %8 : vector<1x4x16x128xf32> to vector<64x128xf32>
    %10 = arith.addf %7, %9 : vector<64x128xf32>
    %cst = arith.constant 0.000000e+00 : f32
    %11 = vector.broadcast %cst : f32 to vector<64x128xf32>
    %12 = arith.maximumf %10, %11 : vector<64x128xf32>
    %13 = vector.shape_cast %12 : vector<64x128xf32> to vector<1x4x16x128xf32>
    %c0_11 = arith.constant 0 : index
    %c0_12 = arith.constant 0 : index
    %c0_13 = arith.constant 0 : index
    %c0_14 = arith.constant 0 : index
    %14 = vector.load %arg6[%c0_11, %c0_12, %c0_13, %c0_14] : memref<1x4x16x128xf32, #tpu.memory_space<vmem>>, vector<1x4x16x128xf32>
    tpu.vector_store %arg6[%c0_11, %c0_12, %c0_13, %c0_14], %13 {strides = array<i32>} : memref<1x4x16x128xf32, #tpu.memory_space<vmem>>, vector<1x4x16x128xf32>,
    return
  }
  func.func @transform_0(%arg0: i32, %arg1: i32) -> (i32, i32, i32, i32) {
    %c0_i32 = arith.constant 0 : i32
    %c0_i32_0 = arith.constant 0 : i32
    %c0_i32_1 = arith.constant 0 : i32
    return %arg0, %arg1, %c0_i32, %c0_i32_0 : i32, i32, i32, i32
  }
  func.func @transform_1(%arg0: i32, %arg1: i32) -> (i32, i32) {
    %c0_i32 = arith.constant 0 : i32
    %c0_i32_0 = arith.constant 0 : i32
    %c0_i32_1 = arith.constant 0 : i32
    return %c0_i32, %c0_i32_0 : i32, i32
  }
  func.func @transform_2(%arg0: i32, %arg1: i32) -> (i32, i32) {
    %c0_i32 = arith.constant 0 : i32
    %c0_i32_0 = arith.constant 0 : i32
    %c0_i32_1 = arith.constant 0 : i32
    return %c0_i32, %c0_i32_0 : i32, i32
  }
  func.func @transform_3(%arg0: i32, %arg1: i32) -> (i32, i32, i32, i32) {
    %c0_i32 = arith.constant 0 : i32
    %c0_i32_0 = arith.constant 0 : i32
    %c0_i32_1 = arith.constant 0 : i32
    return %arg0, %arg1, %c0_i32, %c0_i32_0 : i32, i32, i32, i32
  }
  func.func @transform_4(%arg0: i32, %arg1: i32) -> (i32, i32, i32, i32) {
    %c0_i32 = arith.constant 0 : i32
    %c0_i32_0 = arith.constant 0 : i32
    %c0_i32_1 = arith.constant 0 : i32
    return %arg0, %arg1, %c0_i32, %c0_i32_0 : i32, i32, i32, i32
  }
}

</mosaic_0001>

<bundles_post_ra>
// kernel: _forward_nchw.5
= control target key start
LH: loop header
LB: loop body
LE: loop exit
PB: predicated region body
PF: predicated region fallthrough
CT: control target
= control target key end

     0   :  { %s591_s15 = smov 0   ;;  %s593_s16 = smov 0   ;;  %s666_s0 = inlined_call_operand.vmem [shape: f32[2,16,16,128], index: 0, kind: input, shape index: {}]   ;;  %s667_s1 = inlined_call_operand.vmem [shape: f32[1,128], index: 1, kind: input, shape index: {}]   ;;  %s668_s2 = inlined_call_operand.vmem [shape: f32[1,128], index: 2, kind: input, shape index: {}]   ;;  %s669_s3 = inlined_call_operand.vmem [shape: f32[2,16,16,128], index: 3, kind: input, shape index: {}]   ;;  %s670_s4 = inlined_call_operand.vmem [shape: f32[2,16,16,128], index: 4, kind: output, shape index: {}]  }
   0x1   :  { %s595_s17 = smov 0   ;;  %s597_s18 = smov 0  }
   0x2   :  { %s599_s19 = smov 0  }
   0x3 LB: > { %s23_s20 = sadd.s32 1, %s556_s17  ;;  %s26_s21 = sadd.s32 1, %s560_s18  ;;  %s564_s19 = sphi %s599_s19, %s14_s19   ;;  %s560_s18 = sphi %s597_s18, %s674_s18   ;;  %s556_s17 = sphi %s595_s17, %s673_s17   ;;  %s552_s16 = sphi %s593_s16, %s672_s16   ;;  %s548_s15 = sphi %s591_s15, %s671_s15  }
   0x4   : > { %p24_p0 = scmp.ge.s32.totalorder %s23_s20, 4  ;;  %p469_p1 = scmp.ge.s32.totalorder %s564_s19, 1 }
   0x5   : > { %p202_p2 = scmp.lt.s32.totalorder %s564_s19, 9 }
   0x6   : > { %s676_s20 = smov (%p24_p0, %s23_s20), 0  ;;  %s678_s21 = smov (!%p24_p0, %s26_s21), %s560_s18 }
   0x7   : > { %p203_p3 = pnand %p469_p1, %p202_p2  ;;  %p28_p4 = scmp.ge.s32.totalorder %s678_s21, 2 }
   0x8   : > { %s470_s22 = sshll.u32 (!%p203_p3), %s548_s15, 2  ;;  %p249_p5 = scmp.lt.s32.totalorder (!%p203_p3), %s552_s16, 1 }
   0x9   : > { %s680_s21 = smov (%p28_p4, %s678_s21), 0  ;;  %206 = sbr.rel (%p203_p3) target bundleno = 36 (0x24), region = 36 }
   0xa   : > { %p251_p6 = scmp.lt.s32.totalorder (!%p203_p3), %s470_s22, 15 }
   0xe   : > { %s682_s16 = smov (!%p249_p5, %s552_s16), 1  ;;  %s684_s22 = smov (!%p251_p6, %s470_s22), 15  ;;  %v524_v0 = vld [vmem:[%s667_s1] ss:$0 sm:$0xff] }
   0xf   : > { %s472_s23 = sshll.u32 %s682_s16, 5  ;;  %s471_s24 = sshll.u32 %s684_s22, 1  ;;  %v525_v1 = vld [vmem:[%s668_s2] ss:$0 sm:$0xff] }
  0x10   : > { %s255_s25 = sadd.s32 %s472_s23, %s471_s24 }
  0x11   : > { %s624_s28 = sshll.u32 %s255_s25, 3 }
  0x12   : > { %s257_s5 = scalar_lea.vmem %s666_s0, %s624_s28  ;;  %s634_s8 = scalar_lea.vmem %s669_s3, %s624_s28 }
  0x13   : > { %v281_v2 = vld [vmem:[%s257_s5] sm:$0xff]  ;;  %v282_v3 = vld [vmem:[%s257_s5 + $0x8] sm:$0xff]  ;;  %v283_v7 = vld [vmem:[%s257_s5 + $0x10] sm:$0xff]  ;;  %s279_s13 = scalar_lea.vmem %s670_s4, %s624_s28 }
  0x14   : > { %v293_v4 = vmul.f32 %v524_v0, %v281_v2  ;;  %v313_v5 = vld [vmem:[%s634_s8] sm:$0xff]  ;;  %v294_v6 = vmul.f32 %v524_v0, %v282_v3  ;;  %v314_v8 = vld [vmem:[%s634_s8 + $0x8] sm:$0xff]  ;;  %v295_v9 = vmul.f32 %v524_v0, %v283_v7  ;;  %v284_v10 = vld [vmem:[%s257_s5 + $0x18] sm:$0xff] }
  0x15   : > { %v285_v11 = vld [vmem:[%s257_s5 + $0x20] sm:$0xff]  ;;  %v315_v14 = vld [vmem:[%s634_s8 + $0x10] sm:$0xff]  ;;  %v296_v15 = vmul.f32 %v524_v0, %v284_v10  ;;  %v316_v16 = vld [vmem:[%s634_s8 + $0x18] sm:$0xff] }
  0x16   : > { %v305_v12 = vadd.f32 %v525_v1, %v293_v4  ;;  %v306_v13 = vadd.f32 %v525_v1, %v294_v6  ;;  %v297_v17 = vmul.f32 %v524_v0, %v285_v11  ;;  %v286_v18 = vld [vmem:[%s257_s5 + $0x28] sm:$0xff]  ;;  %v307_v19 = vadd.f32 %v525_v1, %v295_v9  ;;  %v317_v20 = vld [vmem:[%s634_s8 + $0x20] sm:$0xff]  ;;  %v287_v22 = vld [vmem:[%s257_s5 + $0x30] sm:$0xff] }
  0x17   : > { %v298_v21 = vmul.f32 %v524_v0, %v286_v18  ;;  %v288_v23 = vld [vmem:[%s257_s5 + $0x38] sm:$0xff]  ;;  %v308_v26 = vadd.f32 %v525_v1, %v296_v15  ;;  %v318_v28 = vld [vmem:[%s634_s8 + $0x28] sm:$0xff]  ;;  %v299_v31 = vmul.f32 %v524_v0, %v287_v22  ;;  %v319_v37 = vld [vmem:[%s634_s8 + $0x30] sm:$0xff] }
  0x18   : > { %v321_v24 = vadd.f32 %v313_v5, %v305_v12  ;;  %v322_v25 = vadd.f32 %v314_v8, %v306_v13  ;;  %v309_v27 = vadd.f32 %v525_v1, %v297_v17  ;;  %v323_v29 = vadd.f32 %v315_v14, %v307_v19  ;;  %v320_v38 = vld [vmem:[%s634_s8 + $0x38] sm:$0xff] }
  0x19   : > { %v310_v30 = vadd.f32 %v525_v1, %v298_v21  ;;  %v300_v32 = vmul.f32 %v524_v0, %v288_v23  ;;  %v324_v35 = vadd.f32 %v316_v16, %v308_v26  ;;  %v311_v41 = vadd.f32 %v525_v1, %v299_v31 }
  0x1a   : > { %v329_v33 = vmax.f32 %v321_v24, 0.0  ;;  %v330_v34 = vmax.f32 %v322_v25, 0.0  ;;  %v325_v36 = vadd.f32 %v317_v20, %v309_v27  ;;  %v331_v39 = vmax.f32 %v323_v29, 0.0 }
  0x1b   : > { %v326_v40 = vadd.f32 %v318_v28, %v310_v30  ;;  %v312_v42 = vadd.f32 %v525_v1, %v300_v32  ;;  %v332_v43 = vmax.f32 %v324_v35, 0.0  ;;  %v327_v46 = vadd.f32 %v319_v37, %v311_v41 }
  0x1c   : > { %337 = vst [vmem:[%s279_s13] sm:$0xff] %v329_v33  ;;  %v333_v44 = vmax.f32 %v325_v36, 0.0 }
  0x1d   : > { %338 = vst [vmem:[%s279_s13 + $0x8] sm:$0xff] %v330_v34  ;;  %v334_v45 = vmax.f32 %v326_v40, 0.0  ;;  %v328_v47 = vadd.f32 %v320_v38, %v312_v42  ;;  %v335_v48 = vmax.f32 %v327_v46, 0.0 }
  0x1e   : > { %339 = vst [vmem:[%s279_s13 + $0x10] sm:$0xff] %v331_v39 }
  0x1f   : > { %340 = vst [vmem:[%s279_s13 + $0x18] sm:$0xff] %v332_v43  ;;  %v336_v49 = vmax.f32 %v328_v47, 0.0 }
  0x20   : > { %341 = vst [vmem:[%s279_s13 + $0x20] sm:$0xff] %v333_v44 }
  0x21   : > { %342 = vst [vmem:[%s279_s13 + $0x28] sm:$0xff] %v334_v45 }
  0x22   : > { %343 = vst [vmem:[%s279_s13 + $0x30] sm:$0xff] %v335_v48 }
  0x23   : > { %344 = vst [vmem:[%s279_s13 + $0x38] sm:$0xff] %v336_v49 }
  0x24 PF: > { %s14_s19 = sadd.s32 1, %s564_s19   ;;  %s671_s15 = smov %s556_s17 }
  0x25   : > { %p11_p7 = scmp.ge.s32.totalorder %s14_s19, 10   ;;  %s672_s16 = smov %s560_s18 }
  0x26   : > { %s673_s17 = smov %s676_s20  ;;  %s674_s18 = smov %s680_s21 }
  0x27   :  { %13 = sbr.rel (!%p11_p7) target bundleno = 3 (0x3), region = 69 }

// kernel: _forward_nchw.3
= control target key start
LH: loop header
LB: loop body
LE: loop exit
PB: predicated region body
PF: predicated region fallthrough
CT: control target
= control target key end

     0   :  { %s1504_s15 = smov 0   ;;  %s1506_s16 = smov 0   ;;  %s1826_s0 = inlined_call_operand.vmem [shape: f32[2,18,18,4], index: 0, kind: input, shape index: {}]   ;;  %s1827_s1 = inlined_call_operand.vmem [shape: f32[9,4,128], index: 1, kind: input, shape index: {}]   ;;  %s1828_s2 = inlined_call_operand.vmem [shape: f32[2,16,16,128], index: 2, kind: output, shape index: {0}]   ;;  %s1829_s3 = inlined_call_operand.vmem [shape: f32[8,1,128], index: 3, kind: output, shape index: {1}]   ;;  %s1830_s4 = inlined_call_operand.vmem [shape: f32[8,1,128], index: 4, kind: output, shape index: {2}]  }
   0x1   :  { %s1508_s17 = smov 0   ;;  %s1510_s18 = smov 0  }
   0x2   :  { %s1512_s19 = smov 0  }
   0x3 LB: > { %s24_s20 = sadd.s32 1, %s1469_s17  ;;  %s27_s21 = sadd.s32 1, %s1473_s18  ;;  %s1477_s19 = sphi %s1512_s19, %s15_s19   ;;  %s1473_s18 = sphi %s1510_s18, %s1834_s18   ;;  %s1469_s17 = sphi %s1508_s17, %s1833_s17   ;;  %s1465_s16 = sphi %s1506_s16, %s1832_s16   ;;  %s1461_s15 = sphi %s1504_s15, %s1831_s15  }
   0x4   : > { %p25_p0 = scmp.ge.s32.totalorder %s24_s20, 4  ;;  %p1242_p1 = scmp.ge.s32.totalorder %s1477_s19, 1 }
   0x5   : > { %p189_p2 = scmp.lt.s32.totalorder %s1477_s19, 9 }
   0x6   : > { %s1836_s20 = smov (%p25_p0, %s24_s20), 0  ;;  %s1838_s21 = smov (!%p25_p0, %s27_s21), %s1473_s18 }
   0x7   : > { %p190_p3 = pnand %p1242_p1, %p189_p2  ;;  %p29_p4 = scmp.ge.s32.totalorder %s1838_s21, 2 }
   0x8   : > { %p230_p5 = scmp.lt.s32.totalorder (!%p190_p3), %s1465_s16, 1  ;;  %s1251_s7 = smul.u32 (!%p190_p3), 96, %s1461_s15 }
   0x9   : > { %s1840_s21 = smov (%p29_p4, %s1838_s21), 0  ;;  %193 = sbr.rel (%p190_p3) target bundleno = 312 (0x138), region = 28 }
   0xa   : > { %s1244_s28 = sshll.u32 (!%p190_p3), %s1461_s15, 2 }
   0xb   : > { %p238_p6 = scmp.lt.s32.totalorder (!%p190_p3), %s1244_s28, 15 }
   0xe   : > { %v1252_v0 = vld [vmem:[%s1827_s1 + $0x4] sm:$0xf]  ;;  %vm307_vm0 = vcmask 1043456   ;;  %v1271_v1 = vld [vmem:[%s1827_s1 + $0x8] sm:$0xf]  ;;  %s1554_s30 = scalar_select %p230_p5, %s1465_s16, 1 }
   0xf   : > { %1395 = vmatpush.msk.msra.mxu1 %vm307_vm0, %v1252_v0  ;;  %1396 = vmatpush.msk.msra.mxu2 %vm307_vm0, %v1252_v0  ;;  %v1291_v2 = vld [vmem:[%s1827_s1 + $0xc] sm:$0xf]  ;;  %v271_v3 = vld [vmem:[%s1827_s1] sm:$0xf]  ;;  %v1309_v4 = vld [vmem:[%s1827_s1 + $0x10] sm:$0xf] }
  0x10   : > { %1397 = vmatpush.msk.msra.mxu3 %vm307_vm0, %v1252_v0  ;;  %s1398_s8 = smul.u32 432, %s1554_s30  ;;  %1253 = vmatpush.msk.msra.mxu0 %vm307_vm0, %v1252_v0  ;;  %vm282_vm1 = vcmask 31744   ;;  %v1347_v5 = vld [vmem:[%s1827_s1 + $0x18] sm:$0xf]  ;;  %v1365_v6 = vld [vmem:[%s1827_s1 + $0x1c] sm:$0xf] }
  0x11   : > { %1272 = vmatpush.msk.msrb.mxu2 %vm307_vm0, %v1271_v1  ;;  %1262 = vmatpush.msk.msrb.mxu1 %vm307_vm0, %v271_v3  ;;  %v1327_v11 = vld [vmem:[%s1827_s1 + $0x14] sm:$0xf]  ;;  %v1383_v12 = vld [vmem:[%s1827_s1 + $0x20] sm:$0xf]  ;;  %s1842_s28 = smov (!%p238_p6, %s1244_s28), 15  ;;  %s1246_s5 = sshll.u32 %s1554_s30, 5 }
  0x12   : > { %1292 = vmatpush.msk.msrb.mxu3 %vm307_vm0, %v1291_v2  ;;  %1310 = vmatpush.msk.msrb.mxu0 %vm307_vm0, %v1309_v4  ;;  %s234_s11 = scalar_lea.vmem %s1826_s0, %s1398_s8  ;;  %s1245_s29 = sshll.u32 %s1842_s28, 1 }
  0x13   : > { %s1570_s12 = scalar_lea.vmem %s234_s11, %s1251_s7  ;;  %s242_s6 = sadd.s32 %s1246_s5, %s1245_s29 }
  0x14   : > { %v274_v7 = vld [vmem:[%s1570_s12 + $0x19] sm:$0xff]  ;;  %v1580_v8 = vld [vmem:[%s1570_s12 + $0x31] sm:$0xff]  ;;  %v1583_v9 = vld [vmem:[%s1570_s12 + $0x49] sm:$0xff]  ;;  %s1247_s7 = sshll.u32 %s242_s6, 3  ;;  %s1248_s30 = sshll.u32 %s1465_s16, 2 }
  0x15   : > { %1256 = vmatmul.msk.f32.vlgmr.msra.gmra.mxu1 %vm282_vm1, %v274_v7  ;;  %1258 = vmatmul.msk.f32.vlgmr.msra.gmra.mxu2 %vm282_vm1, %v1580_v8  ;;  %v272_v10 = vld [vmem:[%s1570_s12 + $0x1] sm:$0xff]  ;;  %v1604_v14 = vld [vmem:[%s1570_s12 + $0x39] sm:$0xff]  ;;  %v1607_v15 = vld [vmem:[%s1570_s12 + $0x51] sm:$0xff]  ;;  %s1770_s10 = scalar_lea.vmem %s1828_s2, %s1247_s7  ;;  %s247_s11 = sadd.s32 %s1461_s15, %s1248_s30 }
  0x16   : > { %1260 = vmatmul.msk.f32.vlgmr.msra.gmra.mxu3 %vm282_vm1, %v1583_v9  ;;  %1254 = vmatmul.msk.f32.vlgmr.msra.gmra.mxu0 %vm282_vm1, %v272_v10  ;;  %v275_v13 = vld [vmem:[%s1570_s12 + $0x21] sm:$0xff]  ;;  %v273_v16 = vld [vmem:[%s1570_s12 + $0x9] sm:$0xff]  ;;  %v1283_v19 = vld [vmem:[%s1570_s12 + $0x18] sm:$0xff]  ;;  %p248_p7 = scmp.lt.s32.totalorder %s247_s11, 7 }
  0x17   : > { %1348 = vmatpush.msk.msra.mxu2 %vm307_vm0, %v1347_v5  ;;  %1366 = vmatpush.msk.msra.mxu3 %vm307_vm0, %v1365_v6  ;;  %v263_v17 = vld [vmem:[%s1570_s12] sm:$0xff]  ;;  %v264_v20 = vld [vmem:[%s1570_s12 + $0x8] sm:$0xff]  ;;  %v1285_v24 = vld [vmem:[%s1570_s12 + $0x30] sm:$0xff] }
  0x18   : > { %1328 = vmatpush.msk.msra.mxu1 %vm307_vm0, %v1327_v11  ;;  %1384 = vmatpush.msk.msra.mxu0 %vm307_vm0, %v1383_v12  ;;  %v420_v18 = vld [vmem:[%s1570_s12 + $0x2] sm:$0xff]  ;;  %v421_v21 = vld [vmem:[%s1570_s12 + $0xa] sm:$0xff]  ;;  %v422_v23 = vld [vmem:[%s1570_s12 + $0x1a] sm:$0xff]  ;;  %s1844_s11 = smov (!%p248_p7, %s247_s11), 7 }
  0x19   : > { %v1284_v22 = vld [vmem:[%s1570_s12 + $0x20] sm:$0xff]  ;;  %v1286_v26 = vld [vmem:[%s1570_s12 + $0x38] sm:$0xff]  ;;  %v1287_v28 = vld [vmem:[%s1570_s12 + $0x48] sm:$0xff]  ;;  %s250_s16 = scalar_lea.vmem %s1829_s3, %s1844_s11  ;;  %s257_s22 = scalar_lea.vmem %s1830_s4, %s1844_s11 }
  0x1a   : > { %v423_v25 = vld [vmem:[%s1570_s12 + $0x22] sm:$0xff]  ;;  %v424_v27 = vld [vmem:[%s1570_s12 + $0x32] sm:$0xff]  ;;  %v425_v29 = vld [vmem:[%s1570_s12 + $0x3a] sm:$0xff] }
  0x1b   : > { %v1288_v30 = vld [vmem:[%s1570_s12 + $0x50] sm:$0xff]  ;;  %v1289_v32 = vld [vmem:[%s1570_s12 + $0x60] sm:$0xff]  ;;  %v1290_v35 = vld [vmem:[%s1570_s12 + $0x68] sm:$0xff] }
  0x1c   : > { %v426_v31 = vld [vmem:[%s1570_s12 + $0x4a] sm:$0xff]  ;;  %v1307_v33 = vld [vmem:[%s1570_s12 + $0x61] sm:$0xff]  ;;  %v427_v34 = vld [vmem:[%s1570_s12 + $0x52] sm:$0xff] }
  0x1d   : > { %1257 = vmatmul.msk.f32.gmra.mxu1 %vm282_vm1, %v275_v13  ;;  %1259 = vmatmul.msk.f32.gmra.mxu2 %vm282_vm1, %v1604_v14  ;;  %v1308_v36 = vld [vmem:[%s1570_s12 + $0x69] sm:$0xff]  ;;  %v1345_v40 = vld [vmem:[%s1570_s12 + $0x78] sm:$0xff]  ;;  %v1346_v47 = vld [vmem:[%s1570_s12 + $0x80] sm:$0xff] }
  0x1e   : > { %1261 = vmatmul.msk.f32.gmra.mxu3 %vm282_vm1, %v1607_v15  ;;  %1255 = vmatmul.msk.f32.gmra.mxu0 %vm282_vm1, %v273_v16  ;;  %v1379_v37 = vld [vmem:[%s1570_s12 + $0x62] sm:$0xff]  ;;  %v1380_v38 = vld [vmem:[%s1570_s12 + $0x6a] sm:$0xff]  ;;  %v1363_v41 = vld [vmem:[%s1570_s12 + $0x79] sm:$0xff] }
  0x1f   : > { %v1381_v43 = vld [vmem:[%s1570_s12 + $0x7a] sm:$0xff]  ;;  %v1382_v50 = vld [vmem:[%s1570_s12 + $0x82] sm:$0xff] }
  0x20   : > { %v1364_v48 = vld [vmem:[%s1570_s12 + $0x81] sm:$0xff] }
  0x25   : > { %1263 = vmatmul.msk.f32.vlgmr.msrb.gmra.mxu1 %vm282_vm1, %v263_v17  ;;  %1273 = vmatmul.msk.f32.vlgmr.msrb.gmra.mxu2 %vm282_vm1, %v420_v18 }
  0x26   : > { %1293 = vmatmul.msk.f32.vlgmr.msrb.gmra.mxu3 %vm282_vm1, %v1283_v19  ;;  %1311 = vmatmul.msk.f32.vlgmr.msrb.gmra.mxu0 %vm282_vm1, %v274_v7 }
  0x2d   : > { %1264 = vmatmul.msk.f32.gmra.mxu1 %vm282_vm1, %v264_v20  ;;  %1274 = vmatmul.msk.f32.gmra.mxu2 %vm282_vm1, %v421_v21 }
  0x2e   : > { %1294 = vmatmul.msk.f32.gmra.mxu3 %vm282_vm1, %v1284_v22  ;;  %1312 = vmatmul.msk.f32.gmra.mxu0 %vm282_vm1, %v275_v13 }
  0x35   : > { %1265 = vmatmul.msk.f32.gmra.mxu1 %vm282_vm1, %v1283_v19  ;;  %1275 = vmatmul.msk.f32.gmra.mxu2 %vm282_vm1, %v422_v23 }
  0x36   : > { %1295 = vmatmul.msk.f32.gmra.mxu3 %vm282_vm1, %v1285_v24  ;;  %1313 = vmatmul.msk.f32.gmra.mxu0 %vm282_vm1, %v1580_v8 }
  0x3d   : > { %1266 = vmatmul.msk.f32.gmra.mxu1 %vm282_vm1, %v1284_v22  ;;  %1276 = vmatmul.msk.f32.gmra.mxu2 %vm282_vm1, %v423_v25 }
  0x3e   : > { %1296 = vmatmul.msk.f32.gmra.mxu3 %vm282_vm1, %v1286_v26  ;;  %1314 = vmatmul.msk.f32.gmra.mxu0 %vm282_vm1, %v1604_v14 }
  0x45   : > { %1267 = vmatmul.msk.f32.gmra.mxu1 %vm282_vm1, %v1285_v24  ;;  %1277 = vmatmul.msk.f32.gmra.mxu2 %vm282_vm1, %v424_v27 }
  0x46   : > { %1297 = vmatmul.msk.f32.gmra.mxu3 %vm282_vm1, %v1287_v28  ;;  %1315 = vmatmul.msk.f32.gmra.mxu0 %vm282_vm1, %v1583_v9 }
  0x4d   : > { %1268 = vmatmul.msk.f32.gmra.mxu1 %vm282_vm1, %v1286_v26  ;;  %1278 = vmatmul.msk.f32.gmra.mxu2 %vm282_vm1, %v425_v29 }
  0x4e   : > { %1298 = vmatmul.msk.f32.gmra.mxu3 %vm282_vm1, %v1288_v30  ;;  %1316 = vmatmul.msk.f32.gmra.mxu0 %vm282_vm1, %v1607_v15 }
  0x55   : > { %1269 = vmatmul.msk.f32.gmra.mxu1 %vm282_vm1, %v1287_v28  ;;  %1279 = vmatmul.msk.f32.gmra.mxu2 %vm282_vm1, %v426_v31 }
  0x56   : > { %1299 = vmatmul.msk.f32.gmra.mxu3 %vm282_vm1, %v1289_v32  ;;  %1317 = vmatmul.msk.f32.gmra.mxu0 %vm282_vm1, %v1307_v33 }
  0x5d   : > { %1270 = vmatmul.msk.f32.gmra.mxu1 %vm282_vm1, %v1288_v30  ;;  %1280 = vmatmul.msk.f32.gmra.mxu2 %vm282_vm1, %v427_v34 }
  0x5e   : > { %1300 = vmatmul.msk.f32.gmra.mxu3 %vm282_vm1, %v1290_v35  ;;  %1318 = vmatmul.msk.f32.gmra.mxu0 %vm282_vm1, %v1308_v36 }
  0x65   : > { %1329 = vmatmul.msk.f32.vlgmr.msra.gmra.mxu1 %vm282_vm1, %v422_v23  ;;  %1349 = vmatmul.msk.f32.vlgmr.msra.gmra.mxu2 %vm282_vm1, %v1285_v24 }
  0x66   : > { %1367 = vmatmul.msk.f32.vlgmr.msra.gmra.mxu3 %vm282_vm1, %v1580_v8  ;;  %1385 = vmatmul.msk.f32.vlgmr.msra.gmra.mxu0 %vm282_vm1, %v424_v27 }
  0x6d   : > { %1330 = vmatmul.msk.f32.gmra.mxu1 %vm282_vm1, %v423_v25  ;;  %1350 = vmatmul.msk.f32.gmra.mxu2 %vm282_vm1, %v1286_v26 }
  0x6e   : > { %1368 = vmatmul.msk.f32.gmra.mxu3 %vm282_vm1, %v1604_v14  ;;  %1386 = vmatmul.msk.f32.gmra.mxu0 %vm282_vm1, %v425_v29 }
  0x75   : > { %1331 = vmatmul.msk.f32.gmra.mxu1 %vm282_vm1, %v424_v27  ;;  %1351 = vmatmul.msk.f32.gmra.mxu2 %vm282_vm1, %v1287_v28 }
  0x76   : > { %1369 = vmatmul.msk.f32.gmra.mxu3 %vm282_vm1, %v1583_v9  ;;  %1387 = vmatmul.msk.f32.gmra.mxu0 %vm282_vm1, %v426_v31 }
  0x7d   : > { %1332 = vmatmul.msk.f32.gmra.mxu1 %vm282_vm1, %v425_v29  ;;  %1352 = vmatmul.msk.f32.gmra.mxu2 %vm282_vm1, %v1288_v30 }
  0x7e   : > { %1370 = vmatmul.msk.f32.gmra.mxu3 %vm282_vm1, %v1607_v15  ;;  %1388 = vmatmul.msk.f32.gmra.mxu0 %vm282_vm1, %v427_v34 }
  0x85   : > { %1333 = vmatmul.msk.f32.gmra.mxu1 %vm282_vm1, %v426_v31  ;;  %1353 = vmatmul.msk.f32.gmra.mxu2 %vm282_vm1, %v1289_v32 }
  0x86   : > { %1371 = vmatmul.msk.f32.gmra.mxu3 %vm282_vm1, %v1307_v33  ;;  %1389 = vmatmul.msk.f32.gmra.mxu0 %vm282_vm1, %v1379_v37 }
  0x8d   : > { %1334 = vmatmul.msk.f32.gmra.mxu1 %vm282_vm1, %v427_v34  ;;  %1354 = vmatmul.msk.f32.gmra.mxu2 %vm282_vm1, %v1290_v35 }
  0x8e   : > { %1372 = vmatmul.msk.f32.gmra.mxu3 %vm282_vm1, %v1308_v36  ;;  %1390 = vmatmul.msk.f32.gmra.mxu0 %vm282_vm1, %v1380_v38 }
  0x92   : > { %v1702_v39 = vpop.f32.mrf.mxu1 }
  0x93   : > { %v328_v42 = vpop.f32.mrf.mxu0 }
  0x95   : > { %1335 = vmatmul.msk.f32.gmra.mxu1 %vm282_vm1, %v1379_v37  ;;  %1355 = vmatmul.msk.f32.gmra.mxu2 %vm282_vm1, %v1345_v40 }
  0x96   : > { %1373 = vmatmul.msk.f32.gmra.mxu3 %vm282_vm1, %v1363_v41  ;;  %1391 = vmatmul.msk.f32.gmra.mxu0 %vm282_vm1, %v1381_v43 }
  0x98   : > { %v1711_v44 = vpop.f32.mrf.mxu2 }
  0x99   : > { %v1713_v45 = vpop.f32.mrf.mxu3 }
  0x9a   : > { %v1715_v46 = vpop.f32.mrf.mxu1 }
  0x9b   : > { %v331_v49 = vpop.f32.mrf.mxu0 }
  0x9d   : > { %1336 = vmatmul.msk.f32.gmra.mxu1 %vm282_vm1, %v1380_v38  ;;  %1356 = vmatmul.msk.f32.gmra.mxu2 %vm282_vm1, %v1346_v47 }
  0x9e   : > { %1374 = vmatmul.msk.f32.gmra.mxu3 %vm282_vm1, %v1364_v48  ;;  %1392 = vmatmul.msk.f32.gmra.mxu0 %vm282_vm1, %v1382_v50 }
  0xa0   : > { %v1724_v51 = vpop.f32.mrf.mxu2 }
  0xa1   : > { %v1726_v52 = vpop.f32.mrf.mxu3 }
  0xa2   : > { %v396_v53 = vpop.f32.mrf.mxu1 }
  0xa3   : > { %v649_v54 = vpop.f32.mrf.mxu0  ;;  %v397_v18 = vadd.f32 %v396_v53, %v328_v42 }
  0xa8   : > { %v474_v55 = vpop.f32.mrf.mxu2 }
  0xa9   : > { %v563_v56 = vpop.f32.mrf.mxu3  ;;  %v498_v20 = vadd.f32 %v474_v55, %v397_v18 }
  0xaa   : > { %v399_v57 = vpop.f32.mrf.mxu1 }
  0xab   : > { %v652_v58 = vpop.f32.mrf.mxu0  ;;  %v587_v22 = vadd.f32 %v563_v56, %v498_v20  ;;  %v400_v25 = vadd.f32 %v399_v57, %v331_v49 }
  0xad   : > { %v673_v27 = vadd.f32 %v649_v54, %v587_v22 }
  0xb0   : > { %v477_v59 = vpop.f32.mrf.mxu2 }
  0xb1   : > { %v566_v60 = vpop.f32.mrf.mxu3  ;;  %v499_v28 = vadd.f32 %v477_v59, %v400_v25 }
  0xb2   : > { %v402_v61 = vpop.f32.mrf.mxu1 }
  0xb3   : > { %v655_v62 = vpop.f32.mrf.mxu0  ;;  %v588_v31 = vadd.f32 %v566_v60, %v499_v28  ;;  %v403_v35 = vadd.f32 %v402_v61, %v1702_v39 }
  0xb5   : > { %v674_v38 = vadd.f32 %v652_v58, %v588_v31 }
  0xb8   : > { %v480_v63 = vpop.f32.mrf.mxu2 }
  0xb9   : > { %v569_v0 = vpop.f32.mrf.mxu3  ;;  %v500_v40 = vadd.f32 %v480_v63, %v403_v35 }
  0xba   : > { %v405_v1 = vpop.f32.mrf.mxu1 }
  0xbb   : > { %v1728_v2 = vpop.f32.mrf.mxu0  ;;  %v589_v47 = vadd.f32 %v569_v0, %v500_v40  ;;  %v406_v39 = vadd.f32 %v405_v1, %v1715_v46 }
  0xbd   : > { %v675_v55 = vadd.f32 %v655_v62, %v589_v47 }
  0xc0   : > { %v483_v3 = vpop.f32.mrf.mxu2 }
  0xc1   : > { %v1730_v4 = vpop.f32.mrf.mxu3  ;;  %v501_v56 = vadd.f32 %v483_v3, %v406_v39 }
  0xc2   : > { %v1732_v5 = vpop.f32.mrf.mxu1 }
  0xc3   : > { %v1734_v6 = vpop.f32.mrf.mxu0  ;;  %v590_v18 = vadd.f32 %v1730_v4, %v501_v56  ;;  %v409_v46 = vadd.f32 %v1732_v5, %v1711_v44 }
  0xc5   : > { %v676_v3 = vadd.f32 %v1728_v2, %v590_v18 }
  0xc8   : > { %v1736_v7 = vpop.f32.mrf.mxu2 }
  0xc9   : > { %v1738_v8 = vpop.f32.mrf.mxu3  ;;  %v502_v25 = vadd.f32 %v1736_v7, %v409_v46 }
  0xca   : > { %v1740_v9 = vpop.f32.mrf.mxu1 }
  0xcb   : > { %v1742_v10 = vpop.f32.mrf.mxu0  ;;  %v412_v44 = vadd.f32 %v1740_v9, %v1724_v51 }
  0xd0   : > { %v1744_v11 = vpop.f32.mrf.mxu2 }
  0xd1   : > { %v1746_v12 = vpop.f32.mrf.mxu3  ;;  %v503_v35 = vadd.f32 %v1744_v11, %v412_v44 }
  0xd2   : > { %v1748_v13 = vpop.f32.mrf.mxu1 }
  0xd3   : > { %v1750_v14 = vpop.f32.mrf.mxu0  ;;  %v415_v51 = vadd.f32 %v1748_v13, %v1713_v45 }
  0xd8   : > { %v1752_v15 = vpop.f32.mrf.mxu2 }
  0xd9   : > { %v1755_v16 = vpop.f32.mrf.mxu3  ;;  %v504_v11 = vadd.f32 %v1752_v15, %v415_v51 }
  0xda   : > { %v1757_v17 = vpop.f32.mrf.mxu1 }
  0xdb   : > { %v1759_v19 = vpop.f32.mrf.mxu0  ;;  %v418_v45 = vadd.f32 %v1757_v17, %v1726_v52 }
  0xe0   : > { %v1761_v21 = vpop.f32.mrf.mxu2 }
  0xe1   : > { %v1763_v23 = vpop.f32.mrf.mxu3  ;;  %v505_v15 = vadd.f32 %v1761_v21, %v418_v45 }
  0xe2   : > { %v735_v24 = vpop.f32.mrf.mxu1 }
  0xe3   : > { %v996_v26 = vpop.f32.mrf.mxu0  ;;  %v759_v29 = vadd.f32 %v735_v24, %v673_v27 }
  0xe8   : > { %v824_v30 = vpop.f32.mrf.mxu2 }
  0xe9   : > { %v848_v32 = vadd.f32 %v824_v30, %v759_v29  ;;  %v910_v33 = vpop.f32.mrf.mxu3  ;;  %v591_v30 = vadd.f32 %v1738_v8, %v502_v25 }
  0xea   : > { %v738_v34 = vpop.f32.mrf.mxu1 }
  0xeb   : > { %v934_v36 = vadd.f32 %v910_v33, %v848_v32  ;;  %v999_v37 = vpop.f32.mrf.mxu0  ;;  %v760_v42 = vadd.f32 %v738_v34, %v674_v38  ;;  %v677_v7 = vadd.f32 %v1734_v6, %v591_v30 }
  0xed   : > { %v1020_v41 = vadd.f32 %v996_v26, %v934_v36 }
  0xef   : > { %1028 = vst [vmem:[%s1770_s10] sm:$0xff] %v1020_v41  ;;  %v1050_v59 = vmul.f32 %v1020_v41, %v1020_v41 }
  0xf0   : > { %v827_v43 = vpop.f32.mrf.mxu2 }
  0xf1   : > { %v849_v48 = vadd.f32 %v827_v43, %v760_v42  ;;  %v913_v49 = vpop.f32.mrf.mxu3 }
  0xf2   : > { %v741_v50 = vpop.f32.mrf.mxu1 }
  0xf3   : > { %v935_v53 = vadd.f32 %v913_v49, %v849_v48  ;;  %v1002_v54 = vpop.f32.mrf.mxu0  ;;  %v761_v60 = vadd.f32 %v741_v50, %v675_v55  ;;  %v593_v55 = vadd.f32 %v1755_v16, %v504_v11 }
  0xf5   : > { %v1021_v57 = vadd.f32 %v999_v37, %v935_v53  ;;  %v679_v13 = vadd.f32 %v1750_v14, %v593_v55 }
  0xf7   : > { %1029 = vst [vmem:[%s1770_s10 + $0x8] sm:$0xff] %v1021_v57  ;;  %v1036_v58 = vadd.f32 %v1021_v57, %v1020_v41  ;;  %v1051_v61 = vmul.f32 %v1021_v57, %v1021_v57  ;;  %v592_v41 = vadd.f32 %v1746_v12, %v503_v35 }
  0xf8   : > { %v830_v63 = vpop.f32.mrf.mxu2 }
  0xf9   : > { %v1058_v0 = vadd.f32 %v1051_v61, %v1050_v59  ;;  %v850_v20 = vadd.f32 %v830_v63, %v761_v60  ;;  %v916_v22 = vpop.f32.mrf.mxu3  ;;  %v678_v6 = vadd.f32 %v1742_v10, %v592_v41 }
  0xfa   : > { %v744_v24 = vpop.f32.mrf.mxu1 }
  0xfb   : > { %v936_v1 = vadd.f32 %v916_v22, %v850_v20  ;;  %v1005_v62 = vpop.f32.mrf.mxu0  ;;  %v762_v27 = vadd.f32 %v744_v24, %v676_v3  ;;  %v594_v20 = vadd.f32 %v1763_v23, %v505_v15 }
  0xfd   : > { %v1022_v26 = vadd.f32 %v1002_v54, %v936_v1  ;;  %v680_v14 = vadd.f32 %v1759_v19, %v594_v20 }
  0xff   : > { %1030 = vst [vmem:[%s1770_s10 + $0x10] sm:$0xff] %v1022_v26  ;;  %v1037_v28 = vadd.f32 %v1036_v58, %v1022_v26  ;;  %v1052_v29 = vmul.f32 %v1022_v26, %v1022_v26 }
 0x100   : > { %v833_v4 = vpop.f32.mrf.mxu2 }
 0x101   : > { %v1059_v31 = vadd.f32 %v1058_v0, %v1052_v29  ;;  %v851_v32 = vadd.f32 %v833_v4, %v762_v27  ;;  %v919_v33 = vpop.f32.mrf.mxu3 }
 0x102   : > { %v747_v34 = vpop.f32.mrf.mxu1 }
 0x103   : > { %v937_v5 = vadd.f32 %v919_v33, %v851_v32  ;;  %v1008_v2 = vpop.f32.mrf.mxu0  ;;  %v763_v37 = vadd.f32 %v747_v34, %v677_v7 }
 0x105   : > { %v1023_v36 = vadd.f32 %v1005_v62, %v937_v5 }
 0x107   : > { %1031 = vst [vmem:[%s1770_s10 + $0x18] sm:$0xff] %v1023_v36  ;;  %v1038_v38 = vadd.f32 %v1037_v28, %v1023_v36  ;;  %v1053_v40 = vmul.f32 %v1023_v36, %v1023_v36 }
 0x108   : > { %v836_v8 = vpop.f32.mrf.mxu2 }
 0x109   : > { %v1060_v42 = vadd.f32 %v1059_v31, %v1053_v40  ;;  %v852_v43 = vadd.f32 %v836_v8, %v763_v37  ;;  %v922_v47 = vpop.f32.mrf.mxu3 }
 0x10a   : > { %v750_v48 = vpop.f32.mrf.mxu1 }
 0x10b   : > { %v938_v9 = vadd.f32 %v922_v47, %v852_v43  ;;  %v1011_v50 = vpop.f32.mrf.mxu0  ;;  %v764_v39 = vadd.f32 %v750_v48, %v678_v6 }
 0x10d   : > { %v1024_v49 = vadd.f32 %v1008_v2, %v938_v9 }
 0x10f   : > { %1032 = vst [vmem:[%s1770_s10 + $0x20] sm:$0xff] %v1024_v49  ;;  %v1039_v53 = vadd.f32 %v1038_v38, %v1024_v49  ;;  %v1054_v54 = vmul.f32 %v1024_v49, %v1024_v49 }
 0x110   : > { %v839_v12 = vpop.f32.mrf.mxu2 }
 0x111   : > { %v1061_v56 = vadd.f32 %v1060_v42, %v1054_v54  ;;  %v853_v57 = vadd.f32 %v839_v12, %v764_v39  ;;  %v925_v59 = vpop.f32.mrf.mxu3 }
 0x112   : > { %v753_v60 = vpop.f32.mrf.mxu1 }
 0x113   : > { %v939_v10 = vadd.f32 %v925_v59, %v853_v57  ;;  %v765_v61 = vadd.f32 %v753_v60, %v679_v13  ;;  %v1014_v16 = vpop.f32.mrf.mxu0 }
 0x115   : > { %v1025_v58 = vadd.f32 %v1011_v50, %v939_v10 }
 0x117   : > { %1033 = vst [vmem:[%s1770_s10 + $0x28] sm:$0xff] %v1025_v58  ;;  %v1040_v63 = vadd.f32 %v1039_v53, %v1025_v58  ;;  %v1055_v18 = vmul.f32 %v1025_v58, %v1025_v58 }
 0x118   : > { %v842_v0 = vpop.f32.mrf.mxu2 }
 0x119   : > { %v1062_v22 = vadd.f32 %v1061_v56, %v1055_v18  ;;  %v854_v24 = vadd.f32 %v842_v0, %v765_v61  ;;  %v928_v46 = vpop.f32.mrf.mxu3 }
 0x11a   : > { %v756_v17 = vpop.f32.mrf.mxu1 }
 0x11b   : > { %v940_v52 = vadd.f32 %v928_v46, %v854_v24  ;;  %v766_v1 = vadd.f32 %v756_v17, %v680_v14  ;;  %v1017_v23 = vpop.f32.mrf.mxu0 }
 0x11d   : > { %v1026_v21 = vadd.f32 %v1014_v16, %v940_v52 }
 0x11f   : > { %1034 = vst [vmem:[%s1770_s10 + $0x30] sm:$0xff] %v1026_v21  ;;  %v1041_v62 = vadd.f32 %v1040_v63, %v1026_v21  ;;  %v1056_v3 = vmul.f32 %v1026_v21, %v1026_v21 }
 0x120   : > { %v845_v25 = vpop.f32.mrf.mxu2 }
 0x121   : > { %v1063_v26 = vadd.f32 %v1062_v22, %v1056_v3  ;;  %v855_v27 = vadd.f32 %v845_v25, %v766_v1  ;;  %v931_v28 = vpop.f32.mrf.mxu3 }
 0x123   : > { %v941_v29 = vadd.f32 %v931_v28, %v855_v27 }
 0x125   : > { %v1027_v4 = vadd.f32 %v1017_v23, %v941_v29 }
 0x127   : > { %1035 = vst [vmem:[%s1770_s10 + $0x38] sm:$0xff] %v1027_v4  ;;  %v1042_v30 = vadd.f32 %v1041_v62, %v1027_v4  ;;  %v1057_v31 = vmul.f32 %v1027_v4, %v1027_v4 }
 0x129   : > { %v1043_v32 = vrot.slane %v1042_v30, 4  ;;  %v1064_v33 = vadd.f32 %v1063_v26, %v1057_v31 }
 0x12b   : > { %v1044_v19 = vadd.f32 %v1043_v32, %v1042_v30  ;;  %v1065_v34 = vrot.slane %v1064_v33, 4 }
 0x12d   : > { %v1045_v44 = vrot.slane %v1044_v19, 2  ;;  %v1066_v5 = vadd.f32 %v1065_v34, %v1064_v33 }
 0x12f   : > { %v1046_v2 = vadd.f32 %v1045_v44, %v1044_v19  ;;  %v1067_v7 = vrot.slane %v1066_v5, 2 }
 0x131   : > { %v1047_v35 = vrot.slane %v1046_v2, 1  ;;  %v1068_v36 = vadd.f32 %v1067_v7, %v1066_v5 }
 0x133   : > { %v1048_v37 = vadd.f32 %v1047_v35, %v1046_v2  ;;  %v1069_v38 = vrot.slane %v1068_v36, 1 }
 0x135   : > { %1049 = vst [vmem:[%s250_s16] sm:$0x1] %v1048_v37  ;;  %v1070_v40 = vadd.f32 %v1069_v38, %v1068_v36 }
 0x137   : > { %1071 = vst [vmem:[%s257_s22] sm:$0x1] %v1070_v40 }
 0x138 PF: > { %s15_s19 = sadd.s32 1, %s1477_s19   ;;  %s1831_s15 = smov %s1469_s17 }
 0x139   : > { %p12_p8 = scmp.ge.s32.totalorder %s15_s19, 10   ;;  %s1832_s16 = smov %s1473_s18 }
 0x13a   : > { %s1833_s17 = smov %s1836_s20  ;;  %s1834_s18 = smov %s1840_s21 }
 0x13b   :  { %14 = sbr.rel (!%p12_p8) target bundleno = 3 (0x3), region = 93 }

// kernel: _forward_nchw.4
= control target key start
LH: loop header
LB: loop body
LE: loop exit
PB: predicated region body
PF: predicated region fallthrough
CT: control target
= control target key end

     0   :  { %s1462_s15 = smov 0   ;;  %s1464_s16 = smov 0   ;;  %s2178_s0 = inlined_call_operand.vmem [shape: f32[2,18,18,128], index: 0, kind: input, shape index: {}]   ;;  %s2179_s1 = inlined_call_operand.vmem [shape: f32[9,128,128], index: 1, kind: input, shape index: {}]   ;;  %s2180_s2 = inlined_call_operand.vmem [shape: f32[2,16,16,128], index: 2, kind: output, shape index: {0}]   ;;  %s2181_s3 = inlined_call_operand.vmem [shape: f32[8,1,128], index: 3, kind: output, shape index: {1}]   ;;  %s2182_s4 = inlined_call_operand.vmem [shape: f32[8,1,128], index: 4, kind: output, shape index: {2}]  }
   0x1   :  { %s1466_s17 = smov 0   ;;  %s1468_s18 = smov 0  }
   0x2   :  { %s1470_s19 = smov 0  }
   0x3 LB: > { %s24_s20 = sadd.s32 1, %s1427_s17  ;;  %s27_s21 = sadd.s32 1, %s1431_s18  ;;  %s1435_s19 = sphi %s1470_s19, %s15_s19   ;;  %s1431_s18 = sphi %s1468_s18, %s2186_s18   ;;  %s1427_s17 = sphi %s1466_s17, %s2185_s17   ;;  %s1423_s16 = sphi %s1464_s16, %s2184_s16   ;;  %s1419_s15 = sphi %s1462_s15, %s2183_s15  }
   0x4   : > { %p25_p0 = scmp.ge.s32.totalorder %s24_s20, 4  ;;  %p1132_p1 = scmp.ge.s32.totalorder %s1435_s19, 1 }
   0x5   : > { %p189_p2 = scmp.lt.s32.totalorder %s1435_s19, 9 }
   0x6   : > { %s2188_s20 = smov (%p25_p0, %s24_s20), 0  ;;  %s2190_s21 = smov (!%p25_p0, %s27_s21), %s1431_s18 }
   0x7   : > { %p190_p3 = pnand %p1132_p1, %p189_p2  ;;  %p29_p4 = scmp.ge.s32.totalorder %s2190_s21, 2 }
   0x8   : > { %p230_p5 = scmp.lt.s32.totalorder (!%p190_p3), %s1423_s16, 1  ;;  %s1141_s6 = smul.u32 (!%p190_p3), 96, %s1419_s15 }
   0x9   : > { %s2192_s21 = smov (%p29_p4, %s2190_s21), 0  ;;  %193 = sbr.rel (%p190_p3) target bundleno = 349 (0x15d), region = 28 }
   0xe   : > { %v1157_v0 = vld [vmem:[%s2179_s1 + $0xf8] sm:$0xff]  ;;  %v1156_v1 = vld [vmem:[%s2179_s1 + $0xf0] sm:$0xff]  ;;  %v1155_v2 = vld [vmem:[%s2179_s1 + $0xe8] sm:$0xff]  ;;  %s1563_s26 = scalar_select %p230_p5, %s1423_s16, 1 }
   0xf   : > { %1324 = vmatpush.msra.mxu1 %v1157_v0  ;;  %312 = vmatpush.msra.mxu0 %v1157_v0  ;;  %v1173_v3 = vld [vmem:[%s2179_s1 + $0x178] sm:$0xff]  ;;  %v1172_v4 = vld [vmem:[%s2179_s1 + $0x170] sm:$0xff]  ;;  %v1154_v5 = vld [vmem:[%s2179_s1 + $0xe0] sm:$0xff] }
  0x10   : > { %419 = vmatpush.msra.mxu2 %v1173_v3  ;;  %v1171_v6 = vld [vmem:[%s2179_s1 + $0x168] sm:$0xff]  ;;  %v1153_v7 = vld [vmem:[%s2179_s1 + $0xd8] sm:$0xff]  ;;  %v1170_v8 = vld [vmem:[%s2179_s1 + $0x160] sm:$0xff]  ;;  %s1356_s11 = smul.u32 432, %s1563_s26  ;;  %s1136_s22 = sshll.u32 %s1563_s26, 5 }
  0x11   : > { %1325 = vmatpush.msra.mxu1 %v1156_v1  ;;  %313 = vmatpush.msra.mxu0 %v1156_v1  ;;  %v1152_v9 = vld [vmem:[%s2179_s1 + $0xd0] sm:$0xff]  ;;  %v1199_v10 = vld [vmem:[%s2179_s1 + $0x1f8] sm:$0xff]  ;;  %v1151_v13 = vld [vmem:[%s2179_s1 + $0xc8] sm:$0xff]  ;;  %s1138_s26 = sshll.u32 %s1423_s16, 2 }
  0x12   : > { %420 = vmatpush.msra.mxu2 %v1172_v4  ;;  %v1169_v11 = vld [vmem:[%s2179_s1 + $0x158] sm:$0xff]  ;;  %v1198_v12 = vld [vmem:[%s2179_s1 + $0x1f0] sm:$0xff]  ;;  %496 = vmatpush.msra.mxu3 %v1199_v10  ;;  %v1197_v15 = vld [vmem:[%s2179_s1 + $0x1e8] sm:$0xff]  ;;  %s234_s9 = scalar_lea.vmem %s2178_s0, %s1356_s11  ;;  %s247_s28 = sadd.s32 %s1419_s15, %s1138_s26 }
  0x13   : > { %1326 = vmatpush.msra.mxu1 %v1155_v2  ;;  %314 = vmatpush.msra.mxu0 %v1155_v2  ;;  %v1168_v14 = vld [vmem:[%s2179_s1 + $0x150] sm:$0xff]  ;;  %v1150_v16 = vld [vmem:[%s2179_s1 + $0xc0] sm:$0xff]  ;;  %v1167_v17 = vld [vmem:[%s2179_s1 + $0x148] sm:$0xff]  ;;  %s1621_s30 = scalar_lea.vmem %s234_s9, %s1141_s6  ;;  %p248_p7 = scmp.lt.s32.totalorder %s247_s28, 7 }
  0x14   : > { %421 = vmatpush.msra.mxu2 %v1171_v6  ;;  %497 = vmatpush.msra.mxu3 %v1198_v12  ;;  %v1196_v18 = vld [vmem:[%s2179_s1 + $0x1e0] sm:$0xff]  ;;  %v1149_v19 = vld [vmem:[%s2179_s1 + $0xb8] sm:$0xff]  ;;  %v1148_v22 = vld [vmem:[%s2179_s1 + $0xb0] sm:$0xff] }
  0x15   : > { %1327 = vmatpush.msra.mxu1 %v1154_v5  ;;  %315 = vmatpush.msra.mxu0 %v1154_v5  ;;  %v1166_v20 = vld [vmem:[%s2179_s1 + $0x140] sm:$0xff]  ;;  %v1195_v21 = vld [vmem:[%s2179_s1 + $0x1d8] sm:$0xff]  ;;  %v1194_v24 = vld [vmem:[%s2179_s1 + $0x1d0] sm:$0xff]  ;;  %s2196_s28 = smov (!%p248_p7, %s247_s28), 7 }
  0x16   : > { %422 = vmatpush.msra.mxu2 %v1170_v8  ;;  %498 = vmatpush.msra.mxu3 %v1197_v15  ;;  %v1165_v23 = vld [vmem:[%s2179_s1 + $0x138] sm:$0xff]  ;;  %v1147_v25 = vld [vmem:[%s2179_s1 + $0xa8] sm:$0xff]  ;;  %v1164_v26 = vld [vmem:[%s2179_s1 + $0x130] sm:$0xff]  ;;  %s250_s16 = scalar_lea.vmem %s2181_s3, %s2196_s28  ;;  %s257_s8 = scalar_lea.vmem %s2182_s4, %s2196_s28 }
  0x17   : > { %1328 = vmatpush.msra.mxu1 %v1153_v7  ;;  %316 = vmatpush.msra.mxu0 %v1153_v7  ;;  %v1193_v27 = vld [vmem:[%s2179_s1 + $0x1c8] sm:$0xff]  ;;  %v1146_v28 = vld [vmem:[%s2179_s1 + $0xa0] sm:$0xff]  ;;  %v1145_v31 = vld [vmem:[%s2179_s1 + $0x98] sm:$0xff] }
  0x18   : > { %423 = vmatpush.msra.mxu2 %v1169_v11  ;;  %499 = vmatpush.msra.mxu3 %v1196_v18  ;;  %v1163_v29 = vld [vmem:[%s2179_s1 + $0x128] sm:$0xff]  ;;  %v1192_v30 = vld [vmem:[%s2179_s1 + $0x1c0] sm:$0xff]  ;;  %v1191_v33 = vld [vmem:[%s2179_s1 + $0x1b8] sm:$0xff] }
  0x19   : > { %1329 = vmatpush.msra.mxu1 %v1152_v9  ;;  %317 = vmatpush.msra.mxu0 %v1152_v9  ;;  %v1162_v32 = vld [vmem:[%s2179_s1 + $0x120] sm:$0xff]  ;;  %v1144_v34 = vld [vmem:[%s2179_s1 + $0x90] sm:$0xff]  ;;  %v1161_v35 = vld [vmem:[%s2179_s1 + $0x118] sm:$0xff] }
  0x1a   : > { %424 = vmatpush.msra.mxu2 %v1168_v14  ;;  %500 = vmatpush.msra.mxu3 %v1195_v21  ;;  %v1190_v36 = vld [vmem:[%s2179_s1 + $0x1b0] sm:$0xff]  ;;  %v1143_v37 = vld [vmem:[%s2179_s1 + $0x88] sm:$0xff]  ;;  %v1142_v40 = vld [vmem:[%s2179_s1 + $0x80] sm:$0xff] }
  0x1b   : > { %1330 = vmatpush.msra.mxu1 %v1151_v13  ;;  %318 = vmatpush.msra.mxu0 %v1151_v13  ;;  %v1160_v38 = vld [vmem:[%s2179_s1 + $0x110] sm:$0xff]  ;;  %v1189_v39 = vld [vmem:[%s2179_s1 + $0x1a8] sm:$0xff]  ;;  %v286_v43 = vld [vmem:[%s2179_s1 + $0x78] sm:$0xff] }
  0x1c   : > { %425 = vmatpush.msra.mxu2 %v1167_v17  ;;  %501 = vmatpush.msra.mxu3 %v1194_v24  ;;  %v1633_v41 = vld [vmem:[%s1621_s30 + $0x31] sm:$0xff]  ;;  %v287_v42 = vld [vmem:[%s1621_s30 + $0x1] sm:$0xff]  ;;  %v1678_v57 = vld [vmem:[%s1621_s30 + $0x39] sm:$0xff] }
  0x1d   : > { %1331 = vmatpush.msra.mxu1 %v1150_v16  ;;  %319 = vmatpush.msra.mxu0 %v1150_v16  ;;  %v1223_v44 = vld [vmem:[%s2179_s1 + $0x278] sm:$0xff]  ;;  %v1159_v45 = vld [vmem:[%s2179_s1 + $0x108] sm:$0xff]  ;;  %v1188_v46 = vld [vmem:[%s2179_s1 + $0x1a0] sm:$0xff] }
  0x1e   : > { %426 = vmatpush.msra.mxu2 %v1166_v20  ;;  %502 = vmatpush.msra.mxu3 %v1193_v27  ;;  %v285_v47 = vld [vmem:[%s2179_s1 + $0x70] sm:$0xff]  ;;  %v1158_v49 = vld [vmem:[%s2179_s1 + $0x100] sm:$0xff]  ;;  %v1187_v50 = vld [vmem:[%s2179_s1 + $0x198] sm:$0xff] }
  0x1f   : > { %1332 = vmatpush.msra.mxu1 %v1149_v19  ;;  %320 = vmatpush.msra.mxu0 %v1149_v19  ;;  %v1222_v48 = vld [vmem:[%s2179_s1 + $0x270] sm:$0xff]  ;;  %v284_v51 = vld [vmem:[%s2179_s1 + $0x68] sm:$0xff]  ;;  %v283_v55 = vld [vmem:[%s2179_s1 + $0x60] sm:$0xff] }
  0x20   : > { %427 = vmatpush.msra.mxu2 %v1165_v23  ;;  %503 = vmatpush.msra.mxu3 %v1192_v30  ;;  %v1221_v52 = vld [vmem:[%s2179_s1 + $0x268] sm:$0xff]  ;;  %v1186_v54 = vld [vmem:[%s2179_s1 + $0x190] sm:$0xff]  ;;  %v1220_v56 = vld [vmem:[%s2179_s1 + $0x260] sm:$0xff] }
  0x21   : > { %1333 = vmatpush.msra.mxu1 %v1148_v22  ;;  %321 = vmatpush.msra.mxu0 %v1148_v22  ;;  %v394_v53 = vld [vmem:[%s1621_s30 + $0x2] sm:$0xff]  ;;  %v282_v59 = vld [vmem:[%s2179_s1 + $0x58] sm:$0xff]  ;;  %v281_v63 = vld [vmem:[%s2179_s1 + $0x50] sm:$0xff] }
  0x22   : > { %428 = vmatpush.msra.mxu2 %v1164_v26  ;;  %504 = vmatpush.msra.mxu3 %v1191_v33  ;;  %v288_v58 = vld [vmem:[%s1621_s30 + $0x9] sm:$0xff]  ;;  %v1219_v60 = vld [vmem:[%s2179_s1 + $0x258] sm:$0xff]  ;;  %v1184_v2 = vld [vmem:[%s2179_s1 + $0x180] sm:$0xff] }
  0x23   : > { %1334 = vmatpush.msra.mxu1 %v1147_v25  ;;  %322 = vmatpush.msra.mxu0 %v1147_v25  ;;  %v1273_v61 = vld [vmem:[%s2179_s1 + $0x378] sm:$0xff]  ;;  %v1185_v62 = vld [vmem:[%s2179_s1 + $0x188] sm:$0xff]  ;;  %v1218_v0 = vld [vmem:[%s2179_s1 + $0x250] sm:$0xff] }
  0x24   : > { %429 = vmatpush.msra.mxu2 %v1163_v29  ;;  %505 = vmatpush.msra.mxu3 %v1190_v36  ;;  %v1272_v1 = vld [vmem:[%s2179_s1 + $0x370] sm:$0xff]  ;;  %v280_v3 = vld [vmem:[%s2179_s1 + $0x48] sm:$0xff]  ;;  %v1714_v6 = vld [vmem:[%s1621_s30 + $0x18] sm:$0xff] }
  0x25   : > { %1335 = vmatpush.msra.mxu1 %v1146_v28  ;;  %323 = vmatpush.msra.mxu0 %v1146_v28  ;;  %v1217_v4 = vld [vmem:[%s2179_s1 + $0x248] sm:$0xff]  ;;  %v279_v7 = vld [vmem:[%s2179_s1 + $0x40] sm:$0xff]  ;;  %v278_v11 = vld [vmem:[%s2179_s1 + $0x38] sm:$0xff] }
  0x26   : > { %430 = vmatpush.msra.mxu2 %v1162_v32  ;;  %506 = vmatpush.msra.mxu3 %v1189_v39  ;;  %v395_v5 = vld [vmem:[%s1621_s30 + $0xa] sm:$0xff]  ;;  %v1216_v8 = vld [vmem:[%s2179_s1 + $0x240] sm:$0xff]  ;;  %v1215_v12 = vld [vmem:[%s2179_s1 + $0x238] sm:$0xff] }
  0x27   : > { %1336 = vmatpush.msra.mxu1 %v1145_v31  ;;  %324 = vmatpush.msra.mxu0 %v1145_v31  ;;  %v1723_v9 = vld [vmem:[%s1621_s30 + $0x49] sm:$0xff]  ;;  %v1726_v10 = vld [vmem:[%s1621_s30 + $0x19] sm:$0xff]  ;;  %v1774_v25 = vld [vmem:[%s1621_s30 + $0x51] sm:$0xff] }
  0x28   : > { %431 = vmatpush.msra.mxu2 %v1161_v35  ;;  %507 = vmatpush.msra.mxu3 %v1188_v46  ;;  %v1271_v13 = vld [vmem:[%s2179_s1 + $0x368] sm:$0xff]  ;;  %v1297_v14 = vld [vmem:[%s2179_s1 + $0x3f8] sm:$0xff]  ;;  %v277_v15 = vld [vmem:[%s2179_s1 + $0x30] sm:$0xff] }
  0x29   : > { %1337 = vmatpush.msra.mxu1 %v1144_v34  ;;  %325 = vmatpush.msra.mxu0 %v1144_v34  ;;  %v1214_v16 = vld [vmem:[%s2179_s1 + $0x230] sm:$0xff]  ;;  %v1270_v17 = vld [vmem:[%s2179_s1 + $0x360] sm:$0xff]  ;;  %v276_v19 = vld [vmem:[%s2179_s1 + $0x28] sm:$0xff] }
  0x2a   : > { %432 = vmatpush.msra.mxu2 %v1160_v38  ;;  %508 = vmatpush.msra.mxu3 %v1187_v50  ;;  %v1296_v18 = vld [vmem:[%s2179_s1 + $0x3f0] sm:$0xff]  ;;  %v1213_v20 = vld [vmem:[%s2179_s1 + $0x228] sm:$0xff]  ;;  %v1762_v21 = vld [vmem:[%s1621_s30 + $0x1a] sm:$0xff] }
  0x2b   : > { %1338 = vmatpush.msra.mxu1 %v1143_v37  ;;  %326 = vmatpush.msra.mxu0 %v1143_v37  ;;  %v1765_v22 = vld [vmem:[%s1621_s30 + $0x20] sm:$0xff]  ;;  %v274_v27 = vld [vmem:[%s2179_s1 + $0x18] sm:$0xff]  ;;  %v1295_v30 = vld [vmem:[%s2179_s1 + $0x3e8] sm:$0xff] }
  0x2c   : > { %433 = vmatpush.msra.mxu2 %v1159_v45  ;;  %509 = vmatpush.msra.mxu3 %v1186_v54  ;;  %v275_v23 = vld [vmem:[%s2179_s1 + $0x20] sm:$0xff]  ;;  %v1211_v28 = vld [vmem:[%s2179_s1 + $0x218] sm:$0xff]  ;;  %v273_v31 = vld [vmem:[%s2179_s1 + $0x10] sm:$0xff] }
  0x2d   : > { %1339 = vmatpush.msra.mxu1 %v1142_v40  ;;  %327 = vmatpush.msra.mxu0 %v1142_v40  ;;  %v1212_v24 = vld [vmem:[%s2179_s1 + $0x220] sm:$0xff]  ;;  %v1269_v29 = vld [vmem:[%s2179_s1 + $0x358] sm:$0xff]  ;;  %v1210_v32 = vld [vmem:[%s2179_s1 + $0x210] sm:$0xff] }
  0x2e   : > { %340 = vmatmul.f32.vlgmr.msra.gmra.mxu1 %v1633_v41  ;;  %328 = vmatmul.f32.vlgmr.msra.gmra.mxu0 %v287_v42  ;;  %v1777_v26 = vld [vmem:[%s1621_s30 + $0x21] sm:$0xff]  ;;  %v1268_v33 = vld [vmem:[%s2179_s1 + $0x350] sm:$0xff]  ;;  %v1293_v45 = vld [vmem:[%s2179_s1 + $0x3d8] sm:$0xff] }
  0x2f   : > { %353 = vmatpush.msrb.mxu1 %v286_v43  ;;  %570 = vmatpush.msrb.mxu0 %v1223_v44  ;;  %v1294_v34 = vld [vmem:[%s2179_s1 + $0x3e0] sm:$0xff]  ;;  %v272_v35 = vld [vmem:[%s2179_s1 + $0x8] sm:$0xff]  ;;  %v1817_v38 = vld [vmem:[%s1621_s30 + $0x30] sm:$0xff] }
  0x30   : > { %434 = vmatpush.msra.mxu2 %v1158_v49  ;;  %510 = vmatpush.msra.mxu3 %v1185_v62  ;;  %v1209_v36 = vld [vmem:[%s2179_s1 + $0x208] sm:$0xff]  ;;  %v271_v39 = vld [vmem:[%s2179_s1] sm:$0xff]  ;;  %v1247_v43 = vld [vmem:[%s2179_s1 + $0x2f8] sm:$0xff] }
  0x31   : > { %354 = vmatpush.msrb.mxu1 %v285_v47  ;;  %571 = vmatpush.msrb.mxu0 %v1222_v48  ;;  %v1814_v37 = vld [vmem:[%s1621_s30 + $0x22] sm:$0xff]  ;;  %v1840_v46 = vld [vmem:[%s2179_s1 + $0x478] sm:$0xff]  ;;  %v1246_v47 = vld [vmem:[%s2179_s1 + $0x2f0] sm:$0xff] }
  0x32   : > { %435 = vmatmul.f32.vlgmr.msra.gmra.mxu2 %v394_v53  ;;  %511 = vmatpush.msra.mxu3 %v1184_v2  ;;  %v1208_v40 = vld [vmem:[%s2179_s1 + $0x200] sm:$0xff]  ;;  %v1267_v44 = vld [vmem:[%s2179_s1 + $0x348] sm:$0xff]  ;;  %v1292_v49 = vld [vmem:[%s2179_s1 + $0x3d0] sm:$0xff] }
  0x33   : > { %355 = vmatpush.msrb.mxu1 %v284_v51  ;;  %572 = vmatpush.msrb.mxu0 %v1221_v52  ;;  %v263_v42 = vld [vmem:[%s1621_s30] sm:$0xff]  ;;  %v1855_v50 = vld [vmem:[%s2179_s1 + $0x470] sm:$0xff]  ;;  %v1245_v51 = vld [vmem:[%s2179_s1 + $0x2e8] sm:$0xff] }
  0x34   : > { %721 = vmatpush.msrb.mxu2 %v1273_v61  ;;  %512 = vmatmul.f32.vlgmr.msra.gmra.mxu3 %v1714_v6  ;;  %v1266_v48 = vld [vmem:[%s2179_s1 + $0x340] sm:$0xff]  ;;  %v1265_v52 = vld [vmem:[%s2179_s1 + $0x338] sm:$0xff]  ;;  %v1263_v61 = vld [vmem:[%s2179_s1 + $0x328] sm:$0xff] }
  0x35   : > { %356 = vmatpush.msrb.mxu1 %v283_v55  ;;  %573 = vmatpush.msrb.mxu0 %v1220_v56  ;;  %v1865_v53 = vld [vmem:[%s1621_s30 + $0x32] sm:$0xff]  ;;  %v1244_v55 = vld [vmem:[%s2179_s1 + $0x2e0] sm:$0xff]  ;;  %v1892_v62 = vld [vmem:[%s2179_s1 + $0x468] sm:$0xff] }
  0x36   : > { %343 = vmatmul.f32.gmra.mxu1 %v1678_v57  ;;  %331 = vmatmul.f32.gmra.mxu0 %v288_v58  ;;  %v1868_v54 = vld [vmem:[%s1621_s30 + $0x38] sm:$0xff]  ;;  %v1264_v56 = vld [vmem:[%s2179_s1 + $0x330] sm:$0xff]  ;;  %v264_v58 = vld [vmem:[%s1621_s30 + $0x8] sm:$0xff] }
  0x37   : > { %357 = vmatpush.msrb.mxu1 %v282_v59  ;;  %574 = vmatpush.msrb.mxu0 %v1219_v60  ;;  %v1243_v59 = vld [vmem:[%s2179_s1 + $0x2d8] sm:$0xff]  ;;  %v1291_v60 = vld [vmem:[%s2179_s1 + $0x3c8] sm:$0xff]  ;;  %v1907_v2 = vld [vmem:[%s2179_s1 + $0x460] sm:$0xff] }
  0x38   : > { %722 = vmatpush.msrb.mxu2 %v1272_v1  ;;  %795 = vmatpush.msrb.mxu3 %v1297_v14  ;;  %v1262_v1 = vld [vmem:[%s2179_s1 + $0x320] sm:$0xff]  ;;  %v1260_v14 = vld [vmem:[%s2179_s1 + $0x310] sm:$0xff] }
  0x39   : > { %358 = vmatpush.msrb.mxu1 %v281_v63  ;;  %575 = vmatpush.msrb.mxu0 %v1218_v0  ;;  %v1242_v63 = vld [vmem:[%s2179_s1 + $0x2d0] sm:$0xff]  ;;  %v1290_v0 = vld [vmem:[%s2179_s1 + $0x3c0] sm:$0xff] }
  0x3a   : > { %438 = vmatmul.f32.gmra.mxu2 %v395_v5  ;;  %796 = vmatpush.msrb.mxu3 %v1296_v18  ;;  %v1917_v5 = vld [vmem:[%s1621_s30 + $0x3a] sm:$0xff]  ;;  %v1237_v18 = vld [vmem:[%s2179_s1 + $0x2a8] sm:$0xff] }
  0x3b   : > { %359 = vmatpush.msrb.mxu1 %v280_v3  ;;  %576 = vmatpush.msrb.mxu0 %v1217_v4  ;;  %v1241_v3 = vld [vmem:[%s2179_s1 + $0x2c8] sm:$0xff]  ;;  %v1289_v4 = vld [vmem:[%s2179_s1 + $0x3b8] sm:$0xff] }
  0x3c   : > { %723 = vmatpush.msrb.mxu2 %v1271_v13  ;;  %515 = vmatmul.f32.gmra.mxu3 %v1765_v22  ;;  %v1940_v13 = vld [vmem:[%s2179_s1 + $0x458] sm:$0xff] }
  0x3d   : > { %360 = vmatpush.msrb.mxu1 %v279_v7  ;;  %577 = vmatpush.msrb.mxu0 %v1216_v8  ;;  %v1920_v7 = vld [vmem:[%s1621_s30 + $0x48] sm:$0xff]  ;;  %v1240_v8 = vld [vmem:[%s2179_s1 + $0x2c0] sm:$0xff] }
  0x3e   : > { %346 = vmatmul.f32.gmra.mxu1 %v1723_v9  ;;  %334 = vmatmul.f32.gmra.mxu0 %v1726_v10 }
  0x3f   : > { %361 = vmatpush.msrb.mxu1 %v278_v11  ;;  %578 = vmatpush.msrb.mxu0 %v1215_v12  ;;  %v1239_v11 = vld [vmem:[%s2179_s1 + $0x2b8] sm:$0xff]  ;;  %v1288_v12 = vld [vmem:[%s2179_s1 + $0x3b0] sm:$0xff] }
  0x40   : > { %724 = vmatpush.msrb.mxu2 %v1270_v17  ;;  %797 = vmatpush.msrb.mxu3 %v1295_v30  ;;  %v1956_v17 = vld [vmem:[%s2179_s1 + $0x450] sm:$0xff]  ;;  %v1235_v30 = vld [vmem:[%s2179_s1 + $0x298] sm:$0xff] }
  0x41   : > { %362 = vmatpush.msrb.mxu1 %v277_v15  ;;  %579 = vmatpush.msrb.mxu0 %v1214_v16  ;;  %v1238_v15 = vld [vmem:[%s2179_s1 + $0x2b0] sm:$0xff]  ;;  %v1287_v16 = vld [vmem:[%s2179_s1 + $0x3a8] sm:$0xff] }
  0x42   : > { %441 = vmatmul.f32.gmra.mxu2 %v1762_v21  ;;  %798 = vmatpush.msrb.mxu3 %v1294_v34  ;;  %v2010_v34 = vld [vmem:[%s1621_s30 + $0x52] sm:$0xff] }
  0x43   : > { %363 = vmatpush.msrb.mxu1 %v276_v19  ;;  %580 = vmatpush.msrb.mxu0 %v1213_v20  ;;  %v1286_v19 = vld [vmem:[%s2179_s1 + $0x3a0] sm:$0xff]  ;;  %v1969_v20 = vld [vmem:[%s1621_s30 + $0x4a] sm:$0xff] }
  0x44   : > { %725 = vmatpush.msrb.mxu2 %v1269_v29  ;;  %518 = vmatmul.f32.gmra.mxu3 %v1817_v38  ;;  %v1314_v29 = vld [vmem:[%s2179_s1 + $0x440] sm:$0xff] }
  0x45   : > { %364 = vmatpush.msrb.mxu1 %v275_v23  ;;  %581 = vmatpush.msrb.mxu0 %v1212_v24  ;;  %v1972_v23 = vld [vmem:[%s1621_s30 + $0x50] sm:$0xff]  ;;  %v1315_v24 = vld [vmem:[%s2179_s1 + $0x448] sm:$0xff] }
  0x46   : > { %349 = vmatmul.f32.gmra.mxu1 %v1774_v25  ;;  %337 = vmatmul.f32.gmra.mxu0 %v1777_v26 }
  0x47   : > { %365 = vmatpush.msrb.mxu1 %v274_v27  ;;  %582 = vmatpush.msrb.mxu0 %v1211_v28  ;;  %v1258_v27 = vld [vmem:[%s2179_s1 + $0x300] sm:$0xff]  ;;  %v1285_v28 = vld [vmem:[%s2179_s1 + $0x398] sm:$0xff] }
  0x48   : > { %726 = vmatpush.msrb.mxu2 %v1268_v33  ;;  %799 = vmatpush.msrb.mxu3 %v1293_v45  ;;  %v1234_v33 = vld [vmem:[%s2179_s1 + $0x290] sm:$0xff]  ;;  %v1183_v45 = vld [vmem:[%s1621_s30 + $0x68] sm:$0xff] }
  0x49   : > { %366 = vmatpush.msrb.mxu1 %v273_v31  ;;  %583 = vmatpush.msrb.mxu0 %v1210_v32  ;;  %v1284_v31 = vld [vmem:[%s2179_s1 + $0x390] sm:$0xff]  ;;  %v1313_v32 = vld [vmem:[%s2179_s1 + $0x438] sm:$0xff] }
  0x4a   : > { %444 = vmatmul.f32.gmra.mxu2 %v1814_v37  ;;  %800 = vmatpush.msrb.mxu3 %v1292_v49  ;;  %v1206_v49 = vld [vmem:[%s1621_s30 + $0x61] sm:$0xff] }
  0x4b   : > { %367 = vmatpush.msrb.mxu1 %v272_v35  ;;  %584 = vmatpush.msrb.mxu0 %v1209_v36  ;;  %v2013_v35 = vld [vmem:[%s1621_s30 + $0x60] sm:$0xff]  ;;  %v1312_v36 = vld [vmem:[%s2179_s1 + $0x430] sm:$0xff] }
  0x4c   : > { %727 = vmatpush.msrb.mxu2 %v1267_v44  ;;  %521 = vmatmul.f32.gmra.mxu3 %v1868_v54  ;;  %v1310_v44 = vld [vmem:[%s2179_s1 + $0x420] sm:$0xff] }
  0x4d   : > { %368 = vmatpush.msrb.mxu1 %v271_v39  ;;  %585 = vmatpush.msrb.mxu0 %v1208_v40  ;;  %v1233_v39 = vld [vmem:[%s2179_s1 + $0x288] sm:$0xff]  ;;  %v1282_v40 = vld [vmem:[%s2179_s1 + $0x380] sm:$0xff] }
  0x4e   : > { %369 = vmatmul.f32.vlgmr.msrb.gmra.mxu1 %v263_v42  ;;  %586 = vmatmul.f32.vlgmr.msrb.gmra.mxu0 %v1726_v10  ;;  %v1261_v10 = vld [vmem:[%s2179_s1 + $0x318] sm:$0xff]  ;;  %v1311_v42 = vld [vmem:[%s2179_s1 + $0x428] sm:$0xff] }
  0x4f   : > { %644 = vmatpush.msra.mxu1 %v1247_v43  ;;  %869 = vmatpush.msra.mxu0 %v1840_v46  ;;  %v1232_v43 = vld [vmem:[%s2179_s1 + $0x280] sm:$0xff] }
  0x50   : > { %728 = vmatpush.msrb.mxu2 %v1266_v48  ;;  %801 = vmatpush.msrb.mxu3 %v1291_v60  ;;  %v1307_v48 = vld [vmem:[%s2179_s1 + $0x408] sm:$0xff] }
  0x51   : > { %645 = vmatpush.msra.mxu1 %v1246_v47  ;;  %870 = vmatpush.msra.mxu0 %v1855_v50  ;;  %v1308_v47 = vld [vmem:[%s2179_s1 + $0x410] sm:$0xff] }
  0x52   : > { %729 = vmatpush.msrb.mxu2 %v1265_v52  ;;  %802 = vmatpush.msrb.mxu3 %v1290_v0  ;;  %v1281_v52 = vld [vmem:[%s1621_s30 + $0x81] sm:$0xff] }
  0x53   : > { %646 = vmatpush.msra.mxu1 %v1245_v51  ;;  %447 = vmatmul.f32.gmra.mxu2 %v1865_v53  ;;  %v1304_v51 = vld [vmem:[%s1621_s30 + $0x7a] sm:$0xff] }
  0x54   : > { %730 = vmatpush.msrb.mxu2 %v1264_v56  ;;  %871 = vmatpush.msra.mxu0 %v1892_v62 }
  0x55   : > { %647 = vmatpush.msra.mxu1 %v1244_v55  ;;  %803 = vmatpush.msrb.mxu3 %v1289_v4  ;;  %v1303_v55 = vld [vmem:[%s1621_s30 + $0x6a] sm:$0xff] }
  0x56   : > { %372 = vmatmul.f32.gmra.mxu1 %v264_v58  ;;  %589 = vmatmul.f32.gmra.mxu0 %v1777_v26  ;;  %v1236_v26 = vld [vmem:[%s2179_s1 + $0x2a0] sm:$0xff] }
  0x57   : > { %648 = vmatpush.msra.mxu1 %v1243_v59  ;;  %731 = vmatpush.msrb.mxu2 %v1263_v61  ;;  %v1305_v58 = vld [vmem:[%s1621_s30 + $0x82] sm:$0xff] }
  0x58   : > { %872 = vmatpush.msra.mxu0 %v1907_v2  ;;  %524 = vmatmul.f32.gmra.mxu3 %v1920_v7 }
  0x59   : > { %649 = vmatpush.msra.mxu1 %v1242_v63  ;;  %732 = vmatpush.msrb.mxu2 %v1262_v1 }
  0x5a   : > { %804 = vmatpush.msrb.mxu3 %v1288_v12  ;;  %873 = vmatpush.msra.mxu0 %v1940_v13 }
  0x5b   : > { %650 = vmatpush.msra.mxu1 %v1241_v3  ;;  %450 = vmatmul.f32.gmra.mxu2 %v1917_v5 }
  0x5c   : > { %733 = vmatpush.msrb.mxu2 %v1261_v10  ;;  %805 = vmatpush.msrb.mxu3 %v1287_v16 }
  0x5d   : > { %651 = vmatpush.msra.mxu1 %v1240_v8  ;;  %874 = vmatpush.msra.mxu0 %v1956_v17 }
  0x5e   : > { %375 = vmatmul.f32.gmra.mxu1 %v1714_v6  ;;  %592 = vmatmul.f32.gmra.mxu0 %v1633_v41  ;;  %v1259_v6 = vld [vmem:[%s2179_s1 + $0x308] sm:$0xff] }
  0x5f   : > { %652 = vmatpush.msra.mxu1 %v1239_v11  ;;  %734 = vmatpush.msrb.mxu2 %v1260_v14 }
  0x60   : > { %806 = vmatpush.msrb.mxu3 %v1286_v19  ;;  %875 = vmatpush.msra.mxu0 %v1315_v24 }
  0x61   : > { %653 = vmatpush.msra.mxu1 %v1238_v15  ;;  %735 = vmatpush.msrb.mxu2 %v1259_v6 }
  0x62   : > { %527 = vmatmul.f32.gmra.mxu3 %v1972_v23  ;;  %876 = vmatpush.msra.mxu0 %v1314_v29 }
  0x63   : > { %654 = vmatpush.msra.mxu1 %v1237_v18  ;;  %453 = vmatmul.f32.gmra.mxu2 %v1969_v20 }
  0x64   : > { %736 = vmatpush.msrb.mxu2 %v1258_v27  ;;  %807 = vmatpush.msrb.mxu3 %v1285_v28 }
  0x65   : > { %655 = vmatpush.msra.mxu1 %v1236_v26  ;;  %877 = vmatpush.msra.mxu0 %v1313_v32 }
  0x66   : > { %378 = vmatmul.f32.gmra.mxu1 %v1765_v22  ;;  %595 = vmatmul.f32.gmra.mxu0 %v1678_v57  ;;  %v1283_v22 = vld [vmem:[%s2179_s1 + $0x388] sm:$0xff] }
  0x67   : > { %656 = vmatpush.msra.mxu1 %v1235_v30  ;;  %1340 = vmatpush.msra.mxu2 %v1840_v46  ;;  %v1309_v46 = vld [vmem:[%s2179_s1 + $0x418] sm:$0xff] }
  0x68   : > { %808 = vmatpush.msrb.mxu3 %v1284_v31  ;;  %878 = vmatpush.msra.mxu0 %v1312_v36 }
  0x69   : > { %657 = vmatpush.msra.mxu1 %v1234_v33  ;;  %1341 = vmatpush.msra.mxu2 %v1855_v50  ;;  %v1207_v50 = vld [vmem:[%s1621_s30 + $0x69] sm:$0xff] }
  0x6a   : > { %809 = vmatpush.msrb.mxu3 %v1283_v22  ;;  %879 = vmatpush.msra.mxu0 %v1311_v42 }
  0x6b   : > { %456 = vmatmul.f32.gmra.mxu2 %v2010_v34  ;;  %530 = vmatmul.f32.gmra.mxu3 %v2013_v35 }
  0x6c   : > { %658 = vmatpush.msra.mxu1 %v1233_v39  ;;  %1342 = vmatpush.msra.mxu2 %v1892_v62 }
  0x6d   : > { %810 = vmatpush.msrb.mxu3 %v1282_v40  ;;  %880 = vmatpush.msra.mxu0 %v1310_v44 }
  0x6e   : > { %381 = vmatmul.f32.gmra.mxu1 %v1817_v38  ;;  %598 = vmatmul.f32.gmra.mxu0 %v1723_v9 }
  0x6f   : > { %659 = vmatpush.msra.mxu1 %v1232_v43  ;;  %1343 = vmatpush.msra.mxu2 %v1907_v2 }
  0x70   : > { %881 = vmatpush.msra.mxu0 %v1309_v46 }
  0x71   : > { %1344 = vmatpush.msra.mxu2 %v1940_v13 }
  0x72   : > { %882 = vmatpush.msra.mxu0 %v1308_v47 }
  0x73   : > { %737 = vmatmul.f32.vlgmr.msrb.gmra.mxu2 %v1817_v38  ;;  %533 = vmatmul.f32.gmra.mxu3 %v1183_v45  ;;  %v1306_v38 = vld [vmem:[%s2179_s1 + $0x400] sm:$0xff] }
  0x74   : > { %1345 = vmatpush.msra.mxu2 %v1956_v17  ;;  %883 = vmatpush.msra.mxu0 %v1307_v48 }
  0x76   : > { %384 = vmatmul.f32.gmra.mxu1 %v1868_v54  ;;  %601 = vmatmul.f32.gmra.mxu0 %v1774_v25 }
  0x77   : > { %1346 = vmatpush.msra.mxu2 %v1315_v24  ;;  %884 = vmatpush.msra.mxu0 %v1306_v38 }
  0x79   : > { %1347 = vmatpush.msra.mxu2 %v1314_v29 }
  0x7b   : > { %1348 = vmatpush.msra.mxu2 %v1313_v32  ;;  %811 = vmatmul.f32.vlgmr.msrb.gmra.mxu3 %v1633_v41  ;;  %v1256_v41 = vld [vmem:[%s1621_s30 + $0x78] sm:$0xff] }
  0x7c   : > { %740 = vmatmul.f32.gmra.mxu2 %v1868_v54 }
  0x7d   : > { %1349 = vmatpush.msra.mxu2 %v1312_v36 }
  0x7e   : > { %387 = vmatmul.f32.gmra.mxu1 %v1920_v7  ;;  %604 = vmatmul.f32.gmra.mxu0 %v1206_v49 }
  0x7f   : > { %1350 = vmatpush.msra.mxu2 %v1311_v42 }
  0x81   : > { %1351 = vmatpush.msra.mxu2 %v1310_v44 }
  0x83   : > { %1352 = vmatpush.msra.mxu2 %v1309_v46  ;;  %814 = vmatmul.f32.gmra.mxu3 %v1678_v57  ;;  %v1257_v57 = vld [vmem:[%s1621_s30 + $0x80] sm:$0xff] }
  0x84   : > { %743 = vmatmul.f32.gmra.mxu2 %v1920_v7 }
  0x85   : > { %1353 = vmatpush.msra.mxu2 %v1308_v47 }
  0x86   : > { %390 = vmatmul.f32.gmra.mxu1 %v1972_v23  ;;  %607 = vmatmul.f32.gmra.mxu0 %v1207_v50 }
  0x87   : > { %1354 = vmatpush.msra.mxu2 %v1307_v48 }
  0x89   : > { %1355 = vmatpush.msra.mxu2 %v1306_v38 }
  0x8b   : > { %817 = vmatmul.f32.gmra.mxu3 %v1723_v9  ;;  %v1280_v9 = vld [vmem:[%s1621_s30 + $0x79] sm:$0xff] }
  0x8c   : > { %746 = vmatmul.f32.gmra.mxu2 %v1972_v23 }
  0x8e   : > { %660 = vmatmul.f32.vlgmr.msra.gmra.mxu1 %v1762_v21  ;;  %885 = vmatmul.f32.vlgmr.msra.gmra.mxu0 %v1865_v53 }
  0x93   : > { %820 = vmatmul.f32.gmra.mxu3 %v1774_v25 }
  0x94   : > { %749 = vmatmul.f32.gmra.mxu2 %v2013_v35 }
  0x96   : > { %663 = vmatmul.f32.gmra.mxu1 %v1814_v37  ;;  %888 = vmatmul.f32.gmra.mxu0 %v1917_v5  ;;  %v1302_v37 = vld [vmem:[%s1621_s30 + $0x62] sm:$0xff]  ;;  %s1134_s30 = sshll.u32 %s1419_s15, 2 }
  0x97   : > { %p238_p6 = scmp.lt.s32.totalorder %s1134_s30, 15 }
  0x99   : > { %s2194_s30 = smov (!%p238_p6, %s1134_s30), 15 }
  0x9a   : > { %s1135_s14 = sshll.u32 %s2194_s30, 1 }
  0x9b   : > { %823 = vmatmul.f32.gmra.mxu3 %v1206_v49  ;;  %s242_s23 = sadd.s32 %s1136_s22, %s1135_s14 }
  0x9c   : > { %752 = vmatmul.f32.gmra.mxu2 %v1183_v45  ;;  %s1137_s24 = sshll.u32 %s242_s23, 3 }
  0x9d   : > { %s2128_s27 = scalar_lea.vmem %s2180_s2, %s1137_s24 }
  0x9e   : > { %666 = vmatmul.f32.gmra.mxu1 %v1865_v53  ;;  %891 = vmatmul.f32.gmra.mxu0 %v1969_v20 }
  0xa3   : > { %826 = vmatmul.f32.gmra.mxu3 %v1207_v50 }
  0xa4   : > { %755 = vmatmul.f32.gmra.mxu2 %v1256_v41 }
  0xa6   : > { %669 = vmatmul.f32.gmra.mxu1 %v1917_v5  ;;  %894 = vmatmul.f32.gmra.mxu0 %v2010_v34 }
  0xab   : > { %v341_v21 = vpop.f32.mrf.mxu1  ;;  %v329_v25 = vpop.f32.mrf.mxu0  ;;  %829 = vmatmul.f32.gmra.mxu3 %v1280_v9 }
  0xac   : > { %758 = vmatmul.f32.gmra.mxu2 %v1257_v57 }
  0xae   : > { %672 = vmatmul.f32.gmra.mxu1 %v1969_v20  ;;  %897 = vmatmul.f32.gmra.mxu0 %v1302_v37 }
  0xb3   : > { %v344_v53 = vpop.f32.mrf.mxu1  ;;  %v332_v54 = vpop.f32.mrf.mxu0  ;;  %832 = vmatmul.f32.gmra.mxu3 %v1281_v52 }
  0xb4   : > { %903 = vmatmul.f32.vlgmr.msra.gmra.mxu2 %v1304_v51 }
  0xb5   : > { %v436_v56 = vpop.f32.mrf.mxu2 }
  0xb6   : > { %675 = vmatmul.f32.gmra.mxu1 %v2010_v34  ;;  %900 = vmatmul.f32.gmra.mxu0 %v1303_v55 }
  0xb7   : > { %v513_v62 = vpop.f32.mrf.mxu3 }
  0xbb   : > { %v347_v59 = vpop.f32.mrf.mxu1  ;;  %v335_v60 = vpop.f32.mrf.mxu0 }
  0xbc   : > { %906 = vmatmul.f32.gmra.mxu2 %v1305_v58 }
  0xbd   : > { %v439_v61 = vpop.f32.mrf.mxu2 }
  0xbe   : > { %678 = vmatmul.f32.gmra.mxu1 %v1302_v37 }
  0xbf   : > { %v516_v2 = vpop.f32.mrf.mxu3 }
  0xc3   : > { %v350_v63 = vpop.f32.mrf.mxu1  ;;  %v338_v0 = vpop.f32.mrf.mxu0 }
  0xc5   : > { %v442_v1 = vpop.f32.mrf.mxu2 }
  0xc6   : > { %681 = vmatmul.f32.gmra.mxu1 %v1303_v55 }
  0xc7   : > { %v2089_v10 = vpop.f32.mrf.mxu3 }
  0xcb   : > { %v370_v3 = vpop.f32.mrf.mxu1  ;;  %v587_v4 = vpop.f32.mrf.mxu0 }
  0xcc   : > { %v371_v5 = vadd.f32 %v370_v3, %v329_v25 }
  0xcd   : > { %v445_v8 = vpop.f32.mrf.mxu2 }
  0xce   : > { %v460_v7 = vadd.f32 %v436_v56, %v371_v5 }
  0xcf   : > { %v2091_v16 = vpop.f32.mrf.mxu3 }
  0xd0   : > { %v537_v9 = vadd.f32 %v513_v62, %v460_v7 }
  0xd2   : > { %v611_v51 = vadd.f32 %v587_v4, %v537_v9 }
  0xd3   : > { %v373_v11 = vpop.f32.mrf.mxu1  ;;  %v590_v12 = vpop.f32.mrf.mxu0 }
  0xd4   : > { %v374_v13 = vadd.f32 %v373_v11, %v332_v54 }
  0xd6   : > { %v461_v14 = vadd.f32 %v439_v61, %v374_v13  ;;  %v448_v15 = vpop.f32.mrf.mxu2 }
  0xd8   : > { %v538_v55 = vadd.f32 %v516_v2, %v461_v14 }
  0xdb   : > { %v376_v17 = vpop.f32.mrf.mxu1  ;;  %v2093_v6 = vpop.f32.mrf.mxu0 }
  0xdc   : > { %v377_v18 = vadd.f32 %v376_v17, %v335_v60  ;;  %v2095_v23 = vpop.f32.mrf.mxu3  ;;  %v612_v60 = vadd.f32 %v590_v12, %v538_v55 }
  0xde   : > { %v462_v19 = vadd.f32 %v442_v1, %v377_v18  ;;  %v451_v20 = vpop.f32.mrf.mxu2 }
  0xe0   : > { %v539_v2 = vadd.f32 %v2089_v10, %v462_v19 }
  0xe2   : > { %v613_v7 = vadd.f32 %v2093_v6, %v539_v2 }
  0xe3   : > { %v379_v24 = vpop.f32.mrf.mxu1  ;;  %v2097_v26 = vpop.f32.mrf.mxu0 }
  0xe4   : > { %v380_v27 = vadd.f32 %v379_v24, %v338_v0 }
  0xe5   : > { %v2101_v30 = vpop.f32.mrf.mxu3 }
  0xe6   : > { %v2099_v28 = vadd.f32 %v445_v8, %v380_v27  ;;  %v454_v29 = vpop.f32.mrf.mxu2 }
  0xeb   : > { %v382_v31 = vpop.f32.mrf.mxu1  ;;  %v2103_v32 = vpop.f32.mrf.mxu0 }
  0xec   : > { %v383_v33 = vadd.f32 %v382_v31, %v341_v21 }
  0xee   : > { %v2105_v22 = vadd.f32 %v448_v15, %v383_v33  ;;  %v457_v34 = vpop.f32.mrf.mxu2  ;;  %v2107_v35 = vpop.f32.mrf.mxu3 }
  0xf3   : > { %v385_v36 = vpop.f32.mrf.mxu1  ;;  %v2109_v39 = vpop.f32.mrf.mxu0 }
  0xf4   : > { %v386_v40 = vadd.f32 %v385_v36, %v344_v53 }
  0xf6   : > { %v2111_v42 = vadd.f32 %v451_v20, %v386_v40  ;;  %v738_v43 = vpop.f32.mrf.mxu2  ;;  %v2113_v44 = vpop.f32.mrf.mxu3  ;;  %v540_v20 = vadd.f32 %v2091_v16, %v2099_v28 }
  0xfb   : > { %v388_v45 = vpop.f32.mrf.mxu1  ;;  %v2115_v46 = vpop.f32.mrf.mxu0 }
  0xfc   : > { %v389_v47 = vadd.f32 %v388_v45, %v347_v59 }
  0xfe   : > { %v2118_v48 = vadd.f32 %v454_v29, %v389_v47  ;;  %v812_v49 = vpop.f32.mrf.mxu3  ;;  %v614_v29 = vadd.f32 %v2097_v26, %v540_v20 }
  0xff   : > { %v741_v38 = vpop.f32.mrf.mxu2 }
 0x103   : > { %v391_v50 = vpop.f32.mrf.mxu1  ;;  %v2120_v41 = vpop.f32.mrf.mxu0 }
 0x104   : > { %v392_v57 = vadd.f32 %v391_v50, %v350_v63 }
 0x106   : > { %v2122_v21 = vadd.f32 %v457_v34, %v392_v57  ;;  %v815_v37 = vpop.f32.mrf.mxu3 }
 0x107   : > { %v744_v25 = vpop.f32.mrf.mxu2 }
 0x10b   : > { %v661_v52 = vpop.f32.mrf.mxu1  ;;  %v886_v53 = vpop.f32.mrf.mxu0 }
 0x10c   : > { %v685_v54 = vadd.f32 %v661_v52, %v611_v51  ;;  %v542_v51 = vadd.f32 %v2101_v30, %v2111_v42 }
 0x10e   : > { %v762_v56 = vadd.f32 %v738_v43, %v685_v54  ;;  %v818_v62 = vpop.f32.mrf.mxu3  ;;  %v541_v43 = vadd.f32 %v2095_v23, %v2105_v22  ;;  %v616_v54 = vadd.f32 %v2109_v39, %v542_v51 }
 0x10f   : > { %v747_v58 = vpop.f32.mrf.mxu2 }
 0x110   : > { %v836_v59 = vadd.f32 %v812_v49, %v762_v56  ;;  %v615_v49 = vadd.f32 %v2103_v32, %v541_v43 }
 0x112   : > { %v910_v61 = vadd.f32 %v886_v53, %v836_v59 }
 0x113   : > { %v664_v63 = vpop.f32.mrf.mxu1  ;;  %v889_v0 = vpop.f32.mrf.mxu0 }
 0x114   : > { %918 = vst [vmem:[%s2128_s27] sm:$0xff] %v910_v61  ;;  %v686_v1 = vadd.f32 %v664_v63, %v612_v60  ;;  %v940_v14 = vmul.f32 %v910_v61, %v910_v61 }
 0x116   : > { %v763_v3 = vadd.f32 %v741_v38, %v686_v1  ;;  %v821_v18 = vpop.f32.mrf.mxu3 }
 0x117   : > { %v750_v4 = vpop.f32.mrf.mxu2 }
 0x118   : > { %v837_v5 = vadd.f32 %v815_v37, %v763_v3 }
 0x11a   : > { %v911_v8 = vadd.f32 %v889_v0, %v837_v5 }
 0x11b   : > { %v667_v11 = vpop.f32.mrf.mxu1  ;;  %v892_v13 = vpop.f32.mrf.mxu0 }
 0x11c   : > { %919 = vst [vmem:[%s2128_s27 + $0x8] sm:$0xff] %v911_v8  ;;  %v926_v12 = vadd.f32 %v911_v8, %v910_v61  ;;  %v941_v15 = vmul.f32 %v911_v8, %v911_v8  ;;  %v687_v17 = vadd.f32 %v667_v11, %v613_v7  ;;  %v543_v61 = vadd.f32 %v2107_v35, %v2118_v48 }
 0x11d   : > { %v544_v8 = vadd.f32 %v2113_v44, %v2122_v21 }
 0x11e   : > { %v948_v24 = vadd.f32 %v941_v15, %v940_v14  ;;  %v764_v10 = vadd.f32 %v744_v25, %v687_v17  ;;  %v824_v16 = vpop.f32.mrf.mxu3  ;;  %v617_v0 = vadd.f32 %v2115_v46, %v543_v61 }
 0x11f   : > { %v753_v19 = vpop.f32.mrf.mxu2  ;;  %v618_v46 = vadd.f32 %v2120_v41, %v544_v8 }
 0x120   : > { %v838_v27 = vadd.f32 %v818_v62, %v764_v10 }
 0x122   : > { %v912_v6 = vadd.f32 %v892_v13, %v838_v27 }
 0x123   : > { %v670_v31 = vpop.f32.mrf.mxu1  ;;  %v895_v33 = vpop.f32.mrf.mxu0 }
 0x124   : > { %920 = vst [vmem:[%s2128_s27 + $0x10] sm:$0xff] %v912_v6  ;;  %v927_v34 = vadd.f32 %v926_v12, %v912_v6  ;;  %v942_v36 = vmul.f32 %v912_v6, %v912_v6  ;;  %v688_v40 = vadd.f32 %v670_v31, %v614_v29 }
 0x126   : > { %v949_v45 = vadd.f32 %v948_v24, %v942_v36  ;;  %v765_v47 = vadd.f32 %v747_v58, %v688_v40  ;;  %v827_v53 = vpop.f32.mrf.mxu3 }
 0x127   : > { %v756_v38 = vpop.f32.mrf.mxu2 }
 0x128   : > { %v839_v28 = vadd.f32 %v821_v18, %v765_v47 }
 0x12a   : > { %v913_v50 = vadd.f32 %v895_v33, %v839_v28 }
 0x12b   : > { %v673_v26 = vpop.f32.mrf.mxu1  ;;  %v898_v37 = vpop.f32.mrf.mxu0 }
 0x12c   : > { %921 = vst [vmem:[%s2128_s27 + $0x18] sm:$0xff] %v913_v50  ;;  %v928_v57 = vadd.f32 %v927_v34, %v913_v50  ;;  %v943_v9 = vmul.f32 %v913_v50, %v913_v50  ;;  %v689_v25 = vadd.f32 %v673_v26, %v615_v49 }
 0x12e   : > { %v950_v52 = vadd.f32 %v949_v45, %v943_v9  ;;  %v766_v23 = vadd.f32 %v750_v4, %v689_v25  ;;  %v830_v2 = vpop.f32.mrf.mxu3 }
 0x12f   : > { %v759_v56 = vpop.f32.mrf.mxu2 }
 0x130   : > { %v840_v22 = vadd.f32 %v824_v16, %v766_v23 }
 0x132   : > { %v914_v55 = vadd.f32 %v898_v37, %v840_v22 }
 0x133   : > { %v676_v32 = vpop.f32.mrf.mxu1  ;;  %v901_v30 = vpop.f32.mrf.mxu0 }
 0x134   : > { %922 = vst [vmem:[%s2128_s27 + $0x20] sm:$0xff] %v914_v55  ;;  %v929_v58 = vadd.f32 %v928_v57, %v914_v55  ;;  %v944_v59 = vmul.f32 %v914_v55, %v914_v55  ;;  %v690_v60 = vadd.f32 %v676_v32, %v616_v54 }
 0x136   : > { %v951_v62 = vadd.f32 %v950_v52, %v944_v59  ;;  %v767_v63 = vadd.f32 %v753_v19, %v690_v60  ;;  %v833_v18 = vpop.f32.mrf.mxu3 }
 0x137   : > { %v904_v7 = vpop.f32.mrf.mxu2 }
 0x138   : > { %v841_v42 = vadd.f32 %v827_v53, %v767_v63 }
 0x13a   : > { %v915_v1 = vadd.f32 %v901_v30, %v841_v42 }
 0x13b   : > { %v679_v39 = vpop.f32.mrf.mxu1 }
 0x13c   : > { %923 = vst [vmem:[%s2128_s27 + $0x28] sm:$0xff] %v915_v1  ;;  %v930_v3 = vadd.f32 %v929_v58, %v915_v1  ;;  %v945_v4 = vmul.f32 %v915_v1, %v915_v1  ;;  %v691_v5 = vadd.f32 %v679_v39, %v617_v0 }
 0x13e   : > { %v952_v35 = vadd.f32 %v951_v62, %v945_v4  ;;  %v768_v48 = vadd.f32 %v756_v38, %v691_v5 }
 0x13f   : > { %v907_v10 = vpop.f32.mrf.mxu2 }
 0x140   : > { %v842_v11 = vadd.f32 %v830_v2, %v768_v48 }
 0x142   : > { %v916_v13 = vadd.f32 %v904_v7, %v842_v11 }
 0x143   : > { %v682_v14 = vpop.f32.mrf.mxu1 }
 0x144   : > { %924 = vst [vmem:[%s2128_s27 + $0x30] sm:$0xff] %v916_v13  ;;  %v931_v12 = vadd.f32 %v930_v3, %v916_v13  ;;  %v946_v15 = vmul.f32 %v916_v13, %v916_v13  ;;  %v692_v17 = vadd.f32 %v682_v14, %v618_v46 }
 0x146   : > { %v953_v20 = vadd.f32 %v952_v35, %v946_v15  ;;  %v769_v24 = vadd.f32 %v759_v56, %v692_v17 }
 0x148   : > { %v843_v19 = vadd.f32 %v833_v18, %v769_v24 }
 0x14a   : > { %v917_v44 = vadd.f32 %v907_v10, %v843_v19 }
 0x14c   : > { %925 = vst [vmem:[%s2128_s27 + $0x38] sm:$0xff] %v917_v44  ;;  %v932_v21 = vadd.f32 %v931_v12, %v917_v44  ;;  %v947_v27 = vmul.f32 %v917_v44, %v917_v44 }
 0x14e   : > { %v933_v29 = vrot.slane %v932_v21, 4  ;;  %v954_v6 = vadd.f32 %v953_v20, %v947_v27 }
 0x150   : > { %v934_v41 = vadd.f32 %v933_v29, %v932_v21  ;;  %v955_v31 = vrot.slane %v954_v6, 4 }
 0x152   : > { %v935_v33 = vrot.slane %v934_v41, 2  ;;  %v956_v34 = vadd.f32 %v955_v31, %v954_v6 }
 0x154   : > { %v936_v36 = vadd.f32 %v935_v33, %v934_v41  ;;  %v957_v40 = vrot.slane %v956_v34, 2 }
 0x156   : > { %v937_v43 = vrot.slane %v936_v36, 1  ;;  %v958_v45 = vadd.f32 %v957_v40, %v956_v34 }
 0x158   : > { %v938_v47 = vadd.f32 %v937_v43, %v936_v36  ;;  %v959_v16 = vrot.slane %v958_v45, 1 }
 0x15a   : > { %939 = vst [vmem:[%s250_s16] sm:$0x1] %v938_v47  ;;  %v960_v28 = vadd.f32 %v959_v16, %v958_v45 }
 0x15c   : > { %961 = vst [vmem:[%s257_s8] sm:$0x1] %v960_v28 }
 0x15d PF: > { %s15_s19 = sadd.s32 1, %s1435_s19   ;;  %s2183_s15 = smov %s1427_s17 }
 0x15e   : > { %p12_p8 = scmp.ge.s32.totalorder %s15_s19, 10   ;;  %s2184_s16 = smov %s1431_s18 }
 0x15f   : > { %s2185_s17 = smov %s2188_s20  ;;  %s2186_s18 = smov %s2192_s21 }
 0x160   :  { %14 = sbr.rel (!%p12_p8) target bundleno = 3 (0x3), region = 93 }

</bundles_post_ra>
